<compile_context>
chip_gen: v7x
topology: tpu7x:2x2x1
jax: 0.10.0
libtpu: 0.0.40
codegen_flags: <defaults>
</compile_context>

<pallas_src>
import functools
from typing import NamedTuple

import jax
import jax.numpy as jnp
from jax.experimental import pallas as pl
from jax.experimental.pallas import tpu as pltpu


_LN_EPS = 1e-5
_TM_ROWS = 256          # token-row tile target (multiple of 256 suits v6e/v7x MXU; tune per gen)
_TQ_TARGET = 128        # attention query tile
_TK_TARGET = 128        # attention kv tile
_VMEM_LIMIT = 48 * 1024 * 1024   # headroom below v7x's 64 MiB physical VMEM


# ----------------------------------------------------------------------------
# Pallas kernels (row-tiled: first refs are (TM, cols) row tiles, then resident consts)
# ----------------------------------------------------------------------------
def _linear_kernel(x_ref, w_ref, b_ref, o_ref):
    # patch embedding: o = x @ W + b
    x = x_ref[...].astype(w_ref.dtype)
    o_ref[...] = (jnp.dot(x, w_ref[...], preferred_element_type=jnp.float32)
                  + b_ref[...]).astype(o_ref.dtype)


def _ln_matmul_kernel(x_ref, g_ref, b_ref, w_ref, o_ref, *, eps):
    # fused LayerNorm + matmul (no bias) : used for LN1 -> QKV (qkv_bias=False)
    x = x_ref[...]
    mu = jnp.mean(x, axis=-1, keepdims=True)
    xc = x - mu
    var = jnp.mean(xc * xc, axis=-1, keepdims=True)
    y = xc * jax.lax.rsqrt(var + eps) * g_ref[...] + b_ref[...]
    o_ref[...] = jnp.dot(y.astype(w_ref.dtype), w_ref[...],
                         preferred_element_type=jnp.float32).astype(o_ref.dtype)


def _ln_matmul_bias_kernel(x_ref, g_ref, b_ref, w_ref, wb_ref, o_ref, *, eps):
    # fused final LayerNorm + decoder linear
    x = x_ref[...]
    mu = jnp.mean(x, axis=-1, keepdims=True)
    xc = x - mu
    var = jnp.mean(xc * xc, axis=-1, keepdims=True)
    y = xc * jax.lax.rsqrt(var + eps) * g_ref[...] + b_ref[...]
    o_ref[...] = (jnp.dot(y.astype(w_ref.dtype), w_ref[...],
                          preferred_element_type=jnp.float32)
                  + wb_ref[...]).astype(o_ref.dtype)


def _matmul_bias_residual_kernel(x_ref, res_ref, w_ref, b_ref, o_ref):
    # fused attention output projection + residual add
    x = x_ref[...].astype(w_ref.dtype)
    o_ref[...] = (jnp.dot(x, w_ref[...], preferred_element_type=jnp.float32)
                  + b_ref[...] + res_ref[...]).astype(o_ref.dtype)


def _ln_mlp_residual_kernel(x_ref, g_ref, b_ref, w1_ref, b1_ref, w2_ref, b2_ref,
                            o_ref, *, eps):
    # fused LN2 + MLP (GELU) + residual add
    x = x_ref[...]
    mu = jnp.mean(x, axis=-1, keepdims=True)
    xc = x - mu
    var = jnp.mean(xc * xc, axis=-1, keepdims=True)
    y = xc * jax.lax.rsqrt(var + eps) * g_ref[...] + b_ref[...]
    h = jnp.dot(y.astype(w1_ref.dtype), w1_ref[...],
                preferred_element_type=jnp.float32) + b1_ref[...]
    # TODO(synk): PyTorch nn.GELU default is the exact erf form; tanh approximation is
    #             used here for a guaranteed TPU/Mosaic elementwise lowering.
    h = jax.nn.gelu(h, approximate=True)
    o_ref[...] = (x + jnp.dot(h.astype(w2_ref.dtype), w2_ref[...],
                              preferred_element_type=jnp.float32)
                  + b2_ref[...]).astype(o_ref.dtype)


def _flash_attn_kernel(q_ref, k_ref, v_ref, o_ref, m_sc, l_sc, acc_sc,
                       *, scale, heads, dh):
    # q_ref/k_ref/v_ref blocks: (1, heads, TQ/TK, dh) bf16; o_ref block: (1, TQ, heads*dh)
    # Online softmax over the KV grid axis (last, "arbitrary"); f32 m/l/acc scratch.
    ki = pl.program_id(2)

    @pl.when(ki == 0)
    def _():
        m_sc[...] = jnp.full_like(m_sc, -jnp.inf)
        l_sc[...] = jnp.zeros_like(l_sc)
        acc_sc[...] = jnp.zeros_like(acc_sc)

    scale_c = jnp.asarray(scale, q_ref.dtype)
    for h in range(heads):                               # static unroll over heads
        q = q_ref[0, h] * scale_c                        # (TQ, dh)  scale folded into q
        k = k_ref[0, h]                                  # (TK, dh)
        v = v_ref[0, h]
        s = jax.lax.dot_general(q, k, (((1,), (1,)), ((), ())),
                                preferred_element_type=jnp.float32)   # (TQ, TK) f32
        m_prev = m_sc[h]                                 # (TQ, 1)
        m_new = jnp.maximum(m_prev, jnp.max(s, axis=-1, keepdims=True))
        alpha = jnp.exp(m_prev - m_new)
        p = jnp.exp(s - m_new)
        l_sc[h] = alpha * l_sc[h] + jnp.sum(p, axis=-1, keepdims=True)
        pv = jnp.dot(p.astype(v.dtype), v, preferred_element_type=jnp.float32)
        lo, hi = h * dh, (h + 1) * dh
        acc_sc[:, lo:hi] = alpha * acc_sc[:, lo:hi] + pv
        m_sc[h] = m_new

    @pl.when(ki == pl.num_programs(2) - 1)
    def _():
        for h in range(heads):
            inv = pl.reciprocal(l_sc[h], approx=True)    # EUP reciprocal, ~free slot
            lo, hi = h * dh, (h + 1) * dh
            acc_sc[:, lo:hi] = acc_sc[:, lo:hi] * inv
        o_ref[0] = acc_sc[...].astype(o_ref.dtype)       # lane-dense (TQ, hidden) store


# ----------------------------------------------------------------------------
# Pallas wrappers
# ----------------------------------------------------------------------------
def _pick_tile(dim, target):
    """Largest tile <= target that divides dim and is a multiple of 8 (else full dim)."""
    if dim <= target:
        return dim
    t = min(target, dim)
    t -= t % 8
    while t >= 8:
        if dim % t == 0:
            return t
        t -= 8
    return dim


def _rowtiled_pallas(kernel, row_args, const_args, out_cols, out_dtype,
                     tm_target=_TM_ROWS):
    """Run `kernel` over row tiles of the 2D row_args; const_args stay resident."""
    rows = row_args[0].shape[0]
    tm = _pick_tile(rows, tm_target)

    def row_spec(a):
        return pl.BlockSpec((tm, a.shape[1]), lambda i: (i, 0))

    def const_spec(a):
        return pl.BlockSpec(a.shape, lambda i, _nd=a.ndim: (0,) * _nd)

    return pl.pallas_call(
        kernel,
        out_shape=jax.ShapeDtypeStruct((rows, out_cols), out_dtype),
        grid=(rows // tm,),
        in_specs=[row_spec(a) for a in row_args] + [const_spec(a) for a in const_args],
        out_specs=pl.BlockSpec((tm, out_cols), lambda i: (i, 0)),
        compiler_params=pltpu.CompilerParams(
            dimension_semantics=("parallel",),
            vmem_limit_bytes=_VMEM_LIMIT),
    )(*row_args, *const_args)


def pallas_flash_attention(q, k, v, *, scale):
    # q, k, v: (B, heads, N, dh) bf16  ->  output (B, N, heads*dh) bf16
    B, H, N, Dh = q.shape
    hid = H * Dh
    tq = _pick_tile(N, _TQ_TARGET)
    tk = _pick_tile(N, _TK_TARGET)
    q_spec = pl.BlockSpec((1, H, tq, Dh), lambda b, qi, ki: (b, 0, qi, 0))
    kv_spec = pl.BlockSpec((1, H, tk, Dh), lambda b, qi, ki: (b, 0, ki, 0))
    o_spec = pl.BlockSpec((1, tq, hid), lambda b, qi, ki: (b, qi, 0))
    return pl.pallas_call(
        functools.partial(_flash_attn_kernel, scale=scale, heads=H, dh=Dh),
        out_shape=jax.ShapeDtypeStruct((B, N, hid), q.dtype),
        grid=(B, N // tq, N // tk),
        in_specs=[q_spec, kv_spec, kv_spec],
        out_specs=o_spec,
        scratch_shapes=[
            pltpu.VMEM((H, tq, 1), jnp.float32),   # running max m
            pltpu.VMEM((H, tq, 1), jnp.float32),   # running denom l
            pltpu.VMEM((tq, hid), jnp.float32),    # output accumulator (lane dense)
        ],
        compiler_params=pltpu.CompilerParams(
            dimension_semantics=("parallel", "parallel", "arbitrary"),
            vmem_limit_bytes=_VMEM_LIMIT),
    )(q, k, v)


# ----------------------------------------------------------------------------
# JAX glue: patch (un)folding (matches MONAI perceptron patch embedding rearrange)
# ----------------------------------------------------------------------------
def extract_patches(x, p):
    # (B, C, D, H, W) -> (B, gd*gh*gw, p*p*p*C)
    B, C, D, H, W = x.shape
    gd, gh, gw = D // p, H // p, W // p
    x = x.reshape(B, C, gd, p, gh, p, gw, p)
    x = x.transpose(0, 2, 4, 6, 3, 5, 7, 1)  # B, gd, gh, gw, p1, p2, p3, C
    return x.reshape(B, gd * gh * gw, p * p * p * C)


def fold_patches(t, p, grid_dhw, c):
    # (B, N, p*p*p*C) -> (B, C, D, H, W)
    B = t.shape[0]
    gd, gh, gw = grid_dhw
    x = t.reshape(B, gd, gh, gw, p, p, p, c)
    x = x.transpose(0, 7, 1, 4, 2, 5, 3, 6)
    return x.reshape(B, c, gd * p, gh * p, gw * p)


# ----------------------------------------------------------------------------
# Config (static Python ints; NEVER traced) and parameters
# ----------------------------------------------------------------------------
class ViTConfig(NamedTuple):
    img_size: int
    patch_size: int
    in_channels: int
    hidden: int
    heads: int
    mlp_dim: int
    layers: int


def init_params(key, cfg):
    n_patches = (cfg.img_size // cfg.patch_size) ** 3
    patch_dim = cfg.in_channels * cfg.patch_size ** 3
    hid, mlp = cfg.hidden, cfg.mlp_dim

    def nrm(k, shape, dtype=jnp.bfloat16, scale=0.02):
        return (scale * jax.random.normal(k, shape, jnp.float32)).astype(dtype)

    keys = jax.random.split(key, 3 + cfg.layers)
    params = {
        # matmul weights stored in bf16 (MXU); biases / LN params / pos-embed in f32
        "patch_w": nrm(keys[0], (patch_dim, hid)),
        "patch_b": jnp.zeros((hid,), jnp.float32),
        "pos_embed": nrm(keys[1], (1, n_patches, hid), jnp.float32),
        "lnf_g": jnp.ones((hid,), jnp.float32),
        "lnf_b": jnp.zeros((hid,), jnp.float32),
        "dec_w": nrm(keys[2], (hid, patch_dim)),
        "dec_b": jnp.zeros((patch_dim,), jnp.float32),
        "layers": [],
    }
    for li in range(cfg.layers):
        lk = jax.random.split(keys[3 + li], 4)
        params["layers"].append({
            "ln1_g": jnp.ones((hid,), jnp.float32),
            "ln1_b": jnp.zeros((hid,), jnp.float32),
            "qkv_w": nrm(lk[0], (hid, 3 * hid)),          # MONAI SABlock: qkv_bias=False
            "proj_w": nrm(lk[1], (hid, hid)),
            "proj_b": jnp.zeros((hid,), jnp.float32),
            "ln2_g": jnp.ones((hid,), jnp.float32),
            "ln2_b": jnp.zeros((hid,), jnp.float32),
            "mlp_w1": nrm(lk[2], (hid, mlp)),
            "mlp_b1": jnp.zeros((mlp,), jnp.float32),
            "mlp_w2": nrm(lk[3], (mlp, hid)),
            "mlp_b2": jnp.zeros((hid,), jnp.float32),
        })
    return params


# ----------------------------------------------------------------------------
# Full forward pass (cfg is a static Python NamedTuple, closed over via partial)
# ----------------------------------------------------------------------------
def pure_vit_forward(cfg, params, x):
    B, C, D, H, W = x.shape
    p = cfg.patch_size
    gd, gh, gw = D // p, H // p, W // p
    hid, heads = cfg.hidden, cfg.heads
    assert hid % heads == 0
    dh = hid // heads
    scale = dh ** -0.5
    n = gd * gh * gw
    patch_dim = C * p ** 3

    # --- PatchEmbeddingBlock (perceptron) ---
    patches = extract_patches(x, p).reshape(B * n, patch_dim)
    tok = _rowtiled_pallas(
        _linear_kernel, [patches],
        [params["patch_w"], params["patch_b"].reshape(1, -1)],
        hid, jnp.float32)
    tok = (tok.reshape(B, n, hid) + params["pos_embed"]).reshape(B * n, hid)
    # dropout_rate=0.0 -> no-op

    # --- Pure_ViT_Transformer3d ---
    for lp in params["layers"]:
        # fused LN1 + QKV projection (bf16 output, no qkv bias)
        qkv = _rowtiled_pallas(
            functools.partial(_ln_matmul_kernel, eps=_LN_EPS),
            [tok],
            [lp["ln1_g"].reshape(1, -1), lp["ln1_b"].reshape(1, -1), lp["qkv_w"]],
            3 * hid, jnp.bfloat16)
        # TODO(synk): this head-split transpose is the one remaining XLA-side relayout;
        #             expressing it in the attention index_map would need a sub-128 lane
        #             block which violates the (8,128) BlockSpec rule.
        qkv = qkv.reshape(B, n, 3, heads, dh).transpose(2, 0, 3, 1, 4)  # (3,B,H,N,dh)
        q, k, v = qkv[0], qkv[1], qkv[2]

        attn = pallas_flash_attention(q, k, v, scale=scale)        # (B, n, hid) bf16

        # fused attention projection + residual add
        tok = _rowtiled_pallas(
            _matmul_bias_residual_kernel,
            [attn.reshape(B * n, hid), tok],
            [lp["proj_w"], lp["proj_b"].reshape(1, -1)],
            hid, jnp.float32)

        # fused LN2 + MLP + residual add
        tok = _rowtiled_pallas(
            functools.partial(_ln_mlp_residual_kernel, eps=_LN_EPS),
            [tok],
            [lp["ln2_g"].reshape(1, -1), lp["ln2_b"].reshape(1, -1),
             lp["mlp_w1"], lp["mlp_b1"].reshape(1, -1),
             lp["mlp_w2"], lp["mlp_b2"].reshape(1, -1)],
            hid, jnp.float32)

    # --- final LayerNorm + pure_vit_decoder (fused) ---
    dec = _rowtiled_pallas(
        functools.partial(_ln_matmul_bias_kernel, eps=_LN_EPS),
        [tok],
        [params["lnf_g"].reshape(1, -1), params["lnf_b"].reshape(1, -1),
         params["dec_w"], params["dec_b"].reshape(1, -1)],
        patch_dim, jnp.float32)

    return fold_patches(dec.reshape(B, n, patch_dim), p, (gd, gh, gw), C)


# ----------------------------------------------------------------------------
if __name__ == "__main__":
    # Small config consistent with the module (original: img=224, patch=16, C=1, 3D).
    cfg = ViTConfig(img_size=8, patch_size=4, in_channels=1,
                    hidden=32, heads=4, mlp_dim=64, layers=2)
    B = 2

    key = jax.random.PRNGKey(0)
    pkey, xkey = jax.random.split(key)
    params = init_params(pkey, cfg)
    x = jax.random.normal(
        xkey, (B, cfg.in_channels, cfg.img_size, cfg.img_size, cfg.img_size),
        jnp.float32)

    fwd = jax.jit(functools.partial(pure_vit_forward, cfg))   # cfg stays static
    out = jax.block_until_ready(fwd(params, x))

    assert out.shape == (B, cfg.in_channels, cfg.img_size, cfg.img_size, cfg.img_size), out.shape
    assert bool(jnp.all(jnp.isfinite(out)))
    print("KERNEL_OK")
</pallas_src>

<mosaic_0001>
module attributes {stable_mosaic.version = 11 : i64} {
  func.func @_linear_kernel(%arg0: i32, %arg1: memref<16x64xf32, #tpu.memory_space<vmem>>, %arg2: memref<64x32xbf16, #tpu.memory_space<vmem>>, %arg3: memref<1x32xf32, #tpu.memory_space<vmem>>, %arg4: memref<16x32xf32, #tpu.memory_space<vmem>>) attributes {dimension_semantics = [#tpu.dimension_semantics<parallel>], iteration_bounds = array<i64: 1>, scalar_prefetch = 0 : i64, scratch_operands = 0 : i64, tpu.core_type = #tpu.core_type<tc>, window_params = [{transform_indices = @transform_0, window_bounds = array<i64: 16, 64>}, {pipeline_mode = #tpu.pipeline_mode<synchronous>, transform_indices = @transform_1, window_bounds = array<i64: 64, 32>}, {pipeline_mode = #tpu.pipeline_mode<synchronous>, transform_indices = @transform_2, window_bounds = array<i64: 1, 32>}, {transform_indices = @transform_3, window_bounds = array<i64: 16, 32>}]} {
    %c0 = arith.constant 0 : index
    %c0_0 = arith.constant 0 : index
    %0 = vector.load %arg1[%c0, %c0_0] : memref<16x64xf32, #tpu.memory_space<vmem>>, vector<16x64xf32>
    %1 = arith.truncf %0 : vector<16x64xf32> to vector<16x64xbf16>
    %c0_1 = arith.constant 0 : index
    %c0_2 = arith.constant 0 : index
    %2 = vector.load %arg2[%c0_1, %c0_2] : memref<64x32xbf16, #tpu.memory_space<vmem>>, vector<64x32xbf16>
    %cst = arith.constant dense<0.000000e+00> : vector<16x32xf32>
    %3 = tpu.matmul %1, %2, %cst {dimension_numbers = #tpu.dot_dimension_numbers<[1], [0], [0], [1], [0, 0, 1, 1], [], []>} : vector<16x64xbf16>, vector<64x32xbf16>, vector<16x32xf32> -> vector<16x32xf32>
    %c0_3 = arith.constant 0 : index
    %c0_4 = arith.constant 0 : index
    %4 = vector.load %arg3[%c0_3, %c0_4] : memref<1x32xf32, #tpu.memory_space<vmem>>, vector<1x32xf32>
    %5 = vector.broadcast %4 : vector<1x32xf32> to vector<16x32xf32>
    %6 = arith.addf %3, %5 : vector<16x32xf32>
    %c0_5 = arith.constant 0 : index
    %c0_6 = arith.constant 0 : index
    %7 = vector.load %arg4[%c0_5, %c0_6] : memref<16x32xf32, #tpu.memory_space<vmem>>, vector<16x32xf32>
    tpu.vector_store %arg4[%c0_5, %c0_6], %6 {strides = array<i32>} : memref<16x32xf32, #tpu.memory_space<vmem>>, vector<16x32xf32>,
    return
  }
  func.func @transform_0(%arg0: i32) -> (i32, i32) {
    %c0_i32 = arith.constant 0 : i32
    %c0_i32_0 = arith.constant 0 : i32
    return %arg0, %c0_i32 : i32, i32
  }
  func.func @transform_1(%arg0: i32) -> (i32, i32) {
    %c0_i32 = arith.constant 0 : i32
    %c0_i32_0 = arith.constant 0 : i32
    %c0_i32_1 = arith.constant 0 : i32
    return %c0_i32, %c0_i32_0 : i32, i32
  }
  func.func @transform_2(%arg0: i32) -> (i32, i32) {
    %c0_i32 = arith.constant 0 : i32
    %c0_i32_0 = arith.constant 0 : i32
    %c0_i32_1 = arith.constant 0 : i32
    return %c0_i32, %c0_i32_0 : i32, i32
  }
  func.func @transform_3(%arg0: i32) -> (i32, i32) {
    %c0_i32 = arith.constant 0 : i32
    %c0_i32_0 = arith.constant 0 : i32
    return %arg0, %c0_i32 : i32, i32
  }
}

module attributes {stable_mosaic.version = 11 : i64} {
  func.func @_ln_matmul_kernel(%arg0: i32, %arg1: memref<16x32xf32, #tpu.memory_space<vmem>>, %arg2: memref<1x32xf32, #tpu.memory_space<vmem>>, %arg3: memref<1x32xf32, #tpu.memory_space<vmem>>, %arg4: memref<32x96xbf16, #tpu.memory_space<vmem>>, %arg5: memref<16x96xbf16, #tpu.memory_space<vmem>>) attributes {dimension_semantics = [#tpu.dimension_semantics<parallel>], iteration_bounds = array<i64: 1>, scalar_prefetch = 0 : i64, scratch_operands = 0 : i64, tpu.core_type = #tpu.core_type<tc>, window_params = [{transform_indices = @transform_0, window_bounds = array<i64: 16, 32>}, {pipeline_mode = #tpu.pipeline_mode<synchronous>, transform_indices = @transform_1, window_bounds = array<i64: 1, 32>}, {pipeline_mode = #tpu.pipeline_mode<synchronous>, transform_indices = @transform_2, window_bounds = array<i64: 1, 32>}, {pipeline_mode = #tpu.pipeline_mode<synchronous>, transform_indices = @transform_3, window_bounds = array<i64: 32, 96>}, {transform_indices = @transform_4, window_bounds = array<i64: 16, 96>}]} {
    %c0 = arith.constant 0 : index
    %c0_0 = arith.constant 0 : index
    %0 = vector.load %arg1[%c0, %c0_0] : memref<16x32xf32, #tpu.memory_space<vmem>>, vector<16x32xf32>
    %cst = arith.constant dense<0.000000e+00> : vector<16xf32>
    %1 = vector.multi_reduction <add>, %0, %cst [1] : vector<16x32xf32> to vector<16xf32>
    %2 = vector.shape_cast %1 : vector<16xf32> to vector<16x1xf32>
    %cst_1 = arith.constant 3.200000e+01 : f32
    %3 = vector.broadcast %cst_1 : f32 to vector<16x1xf32>
    %4 = arith.divf %2, %3 : vector<16x1xf32>
    %5 = vector.broadcast %4 : vector<16x1xf32> to vector<16x32xf32>
    %6 = arith.subf %0, %5 : vector<16x32xf32>
    %7 = arith.mulf %6, %6 : vector<16x32xf32>
    %cst_2 = arith.constant dense<0.000000e+00> : vector<16xf32>
    %8 = vector.multi_reduction <add>, %7, %cst_2 [1] : vector<16x32xf32> to vector<16xf32>
    %9 = vector.shape_cast %8 : vector<16xf32> to vector<16x1xf32>
    %cst_3 = arith.constant 3.200000e+01 : f32
    %10 = vector.broadcast %cst_3 : f32 to vector<16x1xf32>
    %11 = arith.divf %9, %10 : vector<16x1xf32>
    %cst_4 = arith.constant 9.99999974E-6 : f32
    %12 = vector.broadcast %cst_4 : f32 to vector<16x1xf32>
    %13 = arith.addf %11, %12 : vector<16x1xf32>
    %14 = math.rsqrt %13 : vector<16x1xf32>
    %15 = vector.broadcast %14 : vector<16x1xf32> to vector<16x32xf32>
    %16 = arith.mulf %6, %15 : vector<16x32xf32>
    %c0_5 = arith.constant 0 : index
    %c0_6 = arith.constant 0 : index
    %17 = vector.load %arg2[%c0_5, %c0_6] : memref<1x32xf32, #tpu.memory_space<vmem>>, vector<1x32xf32>
    %18 = vector.broadcast %17 : vector<1x32xf32> to vector<16x32xf32>
    %19 = arith.mulf %16, %18 : vector<16x32xf32>
    %c0_7 = arith.constant 0 : index
    %c0_8 = arith.constant 0 : index
    %20 = vector.load %arg3[%c0_7, %c0_8] : memref<1x32xf32, #tpu.memory_space<vmem>>, vector<1x32xf32>
    %21 = vector.broadcast %20 : vector<1x32xf32> to vector<16x32xf32>
    %22 = arith.addf %19, %21 : vector<16x32xf32>
    %23 = arith.truncf %22 : vector<16x32xf32> to vector<16x32xbf16>
    %c0_9 = arith.constant 0 : index
    %c0_10 = arith.constant 0 : index
    %24 = vector.load %arg4[%c0_9, %c0_10] : memref<32x96xbf16, #tpu.memory_space<vmem>>, vector<32x96xbf16>
    %cst_11 = arith.constant dense<0.000000e+00> : vector<16x96xf32>
    %25 = tpu.matmul %23, %24, %cst_11 {dimension_numbers = #tpu.dot_dimension_numbers<[1], [0], [0], [1], [0, 0, 1, 1], [], []>} : vector<16x32xbf16>, vector<32x96xbf16>, vector<16x96xf32> -> vector<16x96xf32>
    %26 = arith.truncf %25 : vector<16x96xf32> to vector<16x96xbf16>
    %c0_12 = arith.constant 0 : index
    %c0_13 = arith.constant 0 : index
    %27 = vector.load %arg5[%c0_12, %c0_13] : memref<16x96xbf16, #tpu.memory_space<vmem>>, vector<16x96xbf16>
    tpu.vector_store %arg5[%c0_12, %c0_13], %26 {strides = array<i32>} : memref<16x96xbf16, #tpu.memory_space<vmem>>, vector<16x96xbf16>,
    return
  }
  func.func @transform_0(%arg0: i32) -> (i32, i32) {
    %c0_i32 = arith.constant 0 : i32
    %c0_i32_0 = arith.constant 0 : i32
    return %arg0, %c0_i32 : i32, i32
  }
  func.func @transform_1(%arg0: i32) -> (i32, i32) {
    %c0_i32 = arith.constant 0 : i32
    %c0_i32_0 = arith.constant 0 : i32
    %c0_i32_1 = arith.constant 0 : i32
    return %c0_i32, %c0_i32_0 : i32, i32
  }
  func.func @transform_2(%arg0: i32) -> (i32, i32) {
    %c0_i32 = arith.constant 0 : i32
    %c0_i32_0 = arith.constant 0 : i32
    %c0_i32_1 = arith.constant 0 : i32
    return %c0_i32, %c0_i32_0 : i32, i32
  }
  func.func @transform_3(%arg0: i32) -> (i32, i32) {
    %c0_i32 = arith.constant 0 : i32
    %c0_i32_0 = arith.constant 0 : i32
    %c0_i32_1 = arith.constant 0 : i32
    return %c0_i32, %c0_i32_0 : i32, i32
  }
  func.func @transform_4(%arg0: i32) -> (i32, i32) {
    %c0_i32 = arith.constant 0 : i32
    %c0_i32_0 = arith.constant 0 : i32
    return %arg0, %c0_i32 : i32, i32
  }
}

module attributes {stable_mosaic.version = 11 : i64} {
  func.func @_matmul_bias_residual_kernel(%arg0: i32, %arg1: memref<16x32xbf16, #tpu.memory_space<vmem>>, %arg2: memref<16x32xf32, #tpu.memory_space<vmem>>, %arg3: memref<32x32xbf16, #tpu.memory_space<vmem>>, %arg4: memref<1x32xf32, #tpu.memory_space<vmem>>, %arg5: memref<16x32xf32, #tpu.memory_space<vmem>>) attributes {dimension_semantics = [#tpu.dimension_semantics<parallel>], iteration_bounds = array<i64: 1>, scalar_prefetch = 0 : i64, scratch_operands = 0 : i64, tpu.core_type = #tpu.core_type<tc>, window_params = [{transform_indices = @transform_0, window_bounds = array<i64: 16, 32>}, {transform_indices = @transform_1, window_bounds = array<i64: 16, 32>}, {pipeline_mode = #tpu.pipeline_mode<synchronous>, transform_indices = @transform_2, window_bounds = array<i64: 32, 32>}, {pipeline_mode = #tpu.pipeline_mode<synchronous>, transform_indices = @transform_3, window_bounds = array<i64: 1, 32>}, {transform_indices = @transform_4, window_bounds = array<i64: 16, 32>}]} {
    %c0 = arith.constant 0 : index
    %c0_0 = arith.constant 0 : index
    %0 = vector.load %arg1[%c0, %c0_0] : memref<16x32xbf16, #tpu.memory_space<vmem>>, vector<16x32xbf16>
    %c0_1 = arith.constant 0 : index
    %c0_2 = arith.constant 0 : index
    %1 = vector.load %arg3[%c0_1, %c0_2] : memref<32x32xbf16, #tpu.memory_space<vmem>>, vector<32x32xbf16>
    %cst = arith.constant dense<0.000000e+00> : vector<16x32xf32>
    %2 = tpu.matmul %0, %1, %cst {dimension_numbers = #tpu.dot_dimension_numbers<[1], [0], [0], [1], [0, 0, 1, 1], [], []>} : vector<16x32xbf16>, vector<32x32xbf16>, vector<16x32xf32> -> vector<16x32xf32>
    %c0_3 = arith.constant 0 : index
    %c0_4 = arith.constant 0 : index
    %3 = vector.load %arg4[%c0_3, %c0_4] : memref<1x32xf32, #tpu.memory_space<vmem>>, vector<1x32xf32>
    %4 = vector.broadcast %3 : vector<1x32xf32> to vector<16x32xf32>
    %5 = arith.addf %2, %4 : vector<16x32xf32>
    %c0_5 = arith.constant 0 : index
    %c0_6 = arith.constant 0 : index
    %6 = vector.load %arg2[%c0_5, %c0_6] : memref<16x32xf32, #tpu.memory_space<vmem>>, vector<16x32xf32>
    %7 = arith.addf %5, %6 : vector<16x32xf32>
    %c0_7 = arith.constant 0 : index
    %c0_8 = arith.constant 0 : index
    %8 = vector.load %arg5[%c0_7, %c0_8] : memref<16x32xf32, #tpu.memory_space<vmem>>, vector<16x32xf32>
    tpu.vector_store %arg5[%c0_7, %c0_8], %7 {strides = array<i32>} : memref<16x32xf32, #tpu.memory_space<vmem>>, vector<16x32xf32>,
    return
  }
  func.func @transform_0(%arg0: i32) -> (i32, i32) {
    %c0_i32 = arith.constant 0 : i32
    %c0_i32_0 = arith.constant 0 : i32
    return %arg0, %c0_i32 : i32, i32
  }
  func.func @transform_1(%arg0: i32) -> (i32, i32) {
    %c0_i32 = arith.constant 0 : i32
    %c0_i32_0 = arith.constant 0 : i32
    return %arg0, %c0_i32 : i32, i32
  }
  func.func @transform_2(%arg0: i32) -> (i32, i32) {
    %c0_i32 = arith.constant 0 : i32
    %c0_i32_0 = arith.constant 0 : i32
    %c0_i32_1 = arith.constant 0 : i32
    return %c0_i32, %c0_i32_0 : i32, i32
  }
  func.func @transform_3(%arg0: i32) -> (i32, i32) {
    %c0_i32 = arith.constant 0 : i32
    %c0_i32_0 = arith.constant 0 : i32
    %c0_i32_1 = arith.constant 0 : i32
    return %c0_i32, %c0_i32_0 : i32, i32
  }
  func.func @transform_4(%arg0: i32) -> (i32, i32) {
    %c0_i32 = arith.constant 0 : i32
    %c0_i32_0 = arith.constant 0 : i32
    return %arg0, %c0_i32 : i32, i32
  }
}

module attributes {stable_mosaic.version = 11 : i64} {
  func.func @_ln_mlp_residual_kernel(%arg0: i32, %arg1: memref<16x32xf32, #tpu.memory_space<vmem>>, %arg2: memref<1x32xf32, #tpu.memory_space<vmem>>, %arg3: memref<1x32xf32, #tpu.memory_space<vmem>>, %arg4: memref<32x64xbf16, #tpu.memory_space<vmem>>, %arg5: memref<1x64xf32, #tpu.memory_space<vmem>>, %arg6: memref<64x32xbf16, #tpu.memory_space<vmem>>, %arg7: memref<1x32xf32, #tpu.memory_space<vmem>>, %arg8: memref<16x32xf32, #tpu.memory_space<vmem>>) attributes {dimension_semantics = [#tpu.dimension_semantics<parallel>], iteration_bounds = array<i64: 1>, scalar_prefetch = 0 : i64, scratch_operands = 0 : i64, tpu.core_type = #tpu.core_type<tc>, window_params = [{transform_indices = @transform_0, window_bounds = array<i64: 16, 32>}, {pipeline_mode = #tpu.pipeline_mode<synchronous>, transform_indices = @transform_1, window_bounds = array<i64: 1, 32>}, {pipeline_mode = #tpu.pipeline_mode<synchronous>, transform_indices = @transform_2, window_bounds = array<i64: 1, 32>}, {pipeline_mode = #tpu.pipeline_mode<synchronous>, transform_indices = @transform_3, window_bounds = array<i64: 32, 64>}, {pipeline_mode = #tpu.pipeline_mode<synchronous>, transform_indices = @transform_4, window_bounds = array<i64: 1, 64>}, {pipeline_mode = #tpu.pipeline_mode<synchronous>, transform_indices = @transform_5, window_bounds = array<i64: 64, 32>}, {pipeline_mode = #tpu.pipeline_mode<synchronous>, transform_indices = @transform_6, window_bounds = array<i64: 1, 32>}, {transform_indices = @transform_7, window_bounds = array<i64: 16, 32>}]} {
    %c0 = arith.constant 0 : index
    %c0_0 = arith.constant 0 : index
    %0 = vector.load %arg1[%c0, %c0_0] : memref<16x32xf32, #tpu.memory_space<vmem>>, vector<16x32xf32>
    %cst = arith.constant dense<0.000000e+00> : vector<16xf32>
    %1 = vector.multi_reduction <add>, %0, %cst [1] : vector<16x32xf32> to vector<16xf32>
    %2 = vector.shape_cast %1 : vector<16xf32> to vector<16x1xf32>
    %cst_1 = arith.constant 3.200000e+01 : f32
    %3 = vector.broadcast %cst_1 : f32 to vector<16x1xf32>
    %4 = arith.divf %2, %3 : vector<16x1xf32>
    %5 = vector.broadcast %4 : vector<16x1xf32> to vector<16x32xf32>
    %6 = arith.subf %0, %5 : vector<16x32xf32>
    %7 = arith.mulf %6, %6 : vector<16x32xf32>
    %cst_2 = arith.constant dense<0.000000e+00> : vector<16xf32>
    %8 = vector.multi_reduction <add>, %7, %cst_2 [1] : vector<16x32xf32> to vector<16xf32>
    %9 = vector.shape_cast %8 : vector<16xf32> to vector<16x1xf32>
    %cst_3 = arith.constant 3.200000e+01 : f32
    %10 = vector.broadcast %cst_3 : f32 to vector<16x1xf32>
    %11 = arith.divf %9, %10 : vector<16x1xf32>
    %cst_4 = arith.constant 9.99999974E-6 : f32
    %12 = vector.broadcast %cst_4 : f32 to vector<16x1xf32>
    %13 = arith.addf %11, %12 : vector<16x1xf32>
    %14 = math.rsqrt %13 : vector<16x1xf32>
    %15 = vector.broadcast %14 : vector<16x1xf32> to vector<16x32xf32>
    %16 = arith.mulf %6, %15 : vector<16x32xf32>
    %c0_5 = arith.constant 0 : index
    %c0_6 = arith.constant 0 : index
    %17 = vector.load %arg2[%c0_5, %c0_6] : memref<1x32xf32, #tpu.memory_space<vmem>>, vector<1x32xf32>
    %18 = vector.broadcast %17 : vector<1x32xf32> to vector<16x32xf32>
    %19 = arith.mulf %16, %18 : vector<16x32xf32>
    %c0_7 = arith.constant 0 : index
    %c0_8 = arith.constant 0 : index
    %20 = vector.load %arg3[%c0_7, %c0_8] : memref<1x32xf32, #tpu.memory_space<vmem>>, vector<1x32xf32>
    %21 = vector.broadcast %20 : vector<1x32xf32> to vector<16x32xf32>
    %22 = arith.addf %19, %21 : vector<16x32xf32>
    %23 = arith.truncf %22 : vector<16x32xf32> to vector<16x32xbf16>
    %c0_9 = arith.constant 0 : index
    %c0_10 = arith.constant 0 : index
    %24 = vector.load %arg4[%c0_9, %c0_10] : memref<32x64xbf16, #tpu.memory_space<vmem>>, vector<32x64xbf16>
    %cst_11 = arith.constant dense<0.000000e+00> : vector<16x64xf32>
    %25 = tpu.matmul %23, %24, %cst_11 {dimension_numbers = #tpu.dot_dimension_numbers<[1], [0], [0], [1], [0, 0, 1, 1], [], []>} : vector<16x32xbf16>, vector<32x64xbf16>, vector<16x64xf32> -> vector<16x64xf32>
    %c0_12 = arith.constant 0 : index
    %c0_13 = arith.constant 0 : index
    %26 = vector.load %arg5[%c0_12, %c0_13] : memref<1x64xf32, #tpu.memory_space<vmem>>, vector<1x64xf32>
    %27 = vector.broadcast %26 : vector<1x64xf32> to vector<16x64xf32>
    %28 = arith.addf %25, %27 : vector<16x64xf32>
    %29 = arith.mulf %28, %28 : vector<16x64xf32>
    %30 = arith.mulf %28, %29 : vector<16x64xf32>
    %cst_14 = arith.constant 4.471500e-02 : f32
    %31 = vector.broadcast %cst_14 : f32 to vector<16x64xf32>
    %32 = arith.mulf %31, %30 : vector<16x64xf32>
    %33 = arith.addf %28, %32 : vector<16x64xf32>
    %cst_15 = arith.constant 0.797884583 : f32
    %34 = vector.broadcast %cst_15 : f32 to vector<16x64xf32>
    %35 = arith.mulf %34, %33 : vector<16x64xf32>
    %36 = math.tanh %35 : vector<16x64xf32>
    %cst_16 = arith.constant 1.000000e+00 : f32
    %37 = vector.broadcast %cst_16 : f32 to vector<16x64xf32>
    %38 = arith.addf %37, %36 : vector<16x64xf32>
    %cst_17 = arith.constant 5.000000e-01 : f32
    %39 = vector.broadcast %cst_17 : f32 to vector<16x64xf32>
    %40 = arith.mulf %39, %38 : vector<16x64xf32>
    %41 = arith.mulf %28, %40 : vector<16x64xf32>
    %42 = arith.truncf %41 : vector<16x64xf32> to vector<16x64xbf16>
    %c0_18 = arith.constant 0 : index
    %c0_19 = arith.constant 0 : index
    %43 = vector.load %arg6[%c0_18, %c0_19] : memref<64x32xbf16, #tpu.memory_space<vmem>>, vector<64x32xbf16>
    %cst_20 = arith.constant dense<0.000000e+00> : vector<16x32xf32>
    %44 = tpu.matmul %42, %43, %cst_20 {dimension_numbers = #tpu.dot_dimension_numbers<[1], [0], [0], [1], [0, 0, 1, 1], [], []>} : vector<16x64xbf16>, vector<64x32xbf16>, vector<16x32xf32> -> vector<16x32xf32>
    %45 = arith.addf %0, %44 : vector<16x32xf32>
    %c0_21 = arith.constant 0 : index
    %c0_22 = arith.constant 0 : index
    %46 = vector.load %arg7[%c0_21, %c0_22] : memref<1x32xf32, #tpu.memory_space<vmem>>, vector<1x32xf32>
    %47 = vector.broadcast %46 : vector<1x32xf32> to vector<16x32xf32>
    %48 = arith.addf %45, %47 : vector<16x32xf32>
    %c0_23 = arith.constant 0 : index
    %c0_24 = arith.constant 0 : index
    %49 = vector.load %arg8[%c0_23, %c0_24] : memref<16x32xf32, #tpu.memory_space<vmem>>, vector<16x32xf32>
    tpu.vector_store %arg8[%c0_23, %c0_24], %48 {strides = array<i32>} : memref<16x32xf32, #tpu.memory_space<vmem>>, vector<16x32xf32>,
    return
  }
  func.func @transform_0(%arg0: i32) -> (i32, i32) {
    %c0_i32 = arith.constant 0 : i32
    %c0_i32_0 = arith.constant 0 : i32
    return %arg0, %c0_i32 : i32, i32
  }
  func.func @transform_1(%arg0: i32) -> (i32, i32) {
    %c0_i32 = arith.constant 0 : i32
    %c0_i32_0 = arith.constant 0 : i32
    %c0_i32_1 = arith.constant 0 : i32
    return %c0_i32, %c0_i32_0 : i32, i32
  }
  func.func @transform_2(%arg0: i32) -> (i32, i32) {
    %c0_i32 = arith.constant 0 : i32
    %c0_i32_0 = arith.constant 0 : i32
    %c0_i32_1 = arith.constant 0 : i32
    return %c0_i32, %c0_i32_0 : i32, i32
  }
  func.func @transform_3(%arg0: i32) -> (i32, i32) {
    %c0_i32 = arith.constant 0 : i32
    %c0_i32_0 = arith.constant 0 : i32
    %c0_i32_1 = arith.constant 0 : i32
    return %c0_i32, %c0_i32_0 : i32, i32
  }
  func.func @transform_4(%arg0: i32) -> (i32, i32) {
    %c0_i32 = arith.constant 0 : i32
    %c0_i32_0 = arith.constant 0 : i32
    %c0_i32_1 = arith.constant 0 : i32
    return %c0_i32, %c0_i32_0 : i32, i32
  }
  func.func @transform_5(%arg0: i32) -> (i32, i32) {
    %c0_i32 = arith.constant 0 : i32
    %c0_i32_0 = arith.constant 0 : i32
    %c0_i32_1 = arith.constant 0 : i32
    return %c0_i32, %c0_i32_0 : i32, i32
  }
  func.func @transform_6(%arg0: i32) -> (i32, i32) {
    %c0_i32 = arith.constant 0 : i32
    %c0_i32_0 = arith.constant 0 : i32
    %c0_i32_1 = arith.constant 0 : i32
    return %c0_i32, %c0_i32_0 : i32, i32
  }
  func.func @transform_7(%arg0: i32) -> (i32, i32) {
    %c0_i32 = arith.constant 0 : i32
    %c0_i32_0 = arith.constant 0 : i32
    return %arg0, %c0_i32 : i32, i32
  }
}

module attributes {stable_mosaic.version = 11 : i64} {
  func.func @_flash_attn_kernel(%arg0: i32, %arg1: i32, %arg2: i32, %arg3: memref<1x4x8x8xbf16, #tpu.memory_space<vmem>>, %arg4: memref<1x4x8x8xbf16, #tpu.memory_space<vmem>>, %arg5: memref<1x4x8x8xbf16, #tpu.memory_space<vmem>>, %arg6: memref<1x8x32xbf16, #tpu.memory_space<vmem>>, %arg7: memref<4x8x1xf32, #tpu.memory_space<vmem>>, %arg8: memref<4x8x1xf32, #tpu.memory_space<vmem>>, %arg9: memref<8x32xf32, #tpu.memory_space<vmem>>) attributes {dimension_semantics = [#tpu.dimension_semantics<parallel>, #tpu.dimension_semantics<parallel>, #tpu.dimension_semantics<arbitrary>], iteration_bounds = array<i64: 2, 1, 1>, scalar_prefetch = 0 : i64, scratch_operands = 3 : i64, tpu.core_type = #tpu.core_type<tc>, window_params = [{transform_indices = @transform_0, window_bounds = array<i64: 1, 4, 8, 8>}, {transform_indices = @transform_1, window_bounds = array<i64: 1, 4, 8, 8>}, {transform_indices = @transform_2, window_bounds = array<i64: 1, 4, 8, 8>}, {transform_indices = @transform_3, window_bounds = array<i64: 1, 8, 32>}]} {
    %c0_i32 = arith.constant 0 : i32
    %0 = arith.cmpi eq, %arg2, %c0_i32 : i32
    %1 = arith.extui %0 : i1 to i32
    %c0_i32_0 = arith.constant 0 : i32
    %2 = arith.cmpi ne, %1, %c0_i32_0 : i32
    scf.if %2 {
      %cst_127 = arith.constant 0xFF800000 : f32
      %158 = vector.broadcast %cst_127 : f32 to vector<4x8x1xf32>
      %c0_128 = arith.constant 0 : index
      %c0_129 = arith.constant 0 : index
      %c0_130 = arith.constant 0 : index
      %159 = vector.load %arg7[%c0_128, %c0_129, %c0_130] : memref<4x8x1xf32, #tpu.memory_space<vmem>>, vector<4x8x1xf32>
      tpu.vector_store %arg7[%c0_128, %c0_129, %c0_130], %158 {strides = array<i32>} : memref<4x8x1xf32, #tpu.memory_space<vmem>>, vector<4x8x1xf32>,
      %cst_131 = arith.constant 0.000000e+00 : f32
      %160 = vector.broadcast %cst_131 : f32 to vector<4x8x1xf32>
      %c0_132 = arith.constant 0 : index
      %c0_133 = arith.constant 0 : index
      %c0_134 = arith.constant 0 : index
      %161 = vector.load %arg8[%c0_132, %c0_133, %c0_134] : memref<4x8x1xf32, #tpu.memory_space<vmem>>, vector<4x8x1xf32>
      tpu.vector_store %arg8[%c0_132, %c0_133, %c0_134], %160 {strides = array<i32>} : memref<4x8x1xf32, #tpu.memory_space<vmem>>, vector<4x8x1xf32>,
      %cst_135 = arith.constant 0.000000e+00 : f32
      %162 = vector.broadcast %cst_135 : f32 to vector<8x32xf32>
      %c0_136 = arith.constant 0 : index
      %c0_137 = arith.constant 0 : index
      %163 = vector.load %arg9[%c0_136, %c0_137] : memref<8x32xf32, #tpu.memory_space<vmem>>, vector<8x32xf32>
      tpu.vector_store %arg9[%c0_136, %c0_137], %162 {strides = array<i32>} : memref<8x32xf32, #tpu.memory_space<vmem>>, vector<8x32xf32>,
    } else {
    }
    %c0 = arith.constant 0 : index
    %c0_1 = arith.constant 0 : index
    %c0_2 = arith.constant 0 : index
    %c0_3 = arith.constant 0 : index
    %3 = vector.load %arg3[%c0, %c0_1, %c0_2, %c0_3] : memref<1x4x8x8xbf16, #tpu.memory_space<vmem>>, vector<1x1x8x8xbf16>
    %4 = vector.shape_cast %3 : vector<1x1x8x8xbf16> to vector<8x8xbf16>
    %cst = arith.constant 3.535160e-01 : bf16
    %5 = vector.broadcast %cst : bf16 to vector<8x8xbf16>
    %6 = arith.mulf %4, %5 : vector<8x8xbf16>
    %c0_4 = arith.constant 0 : index
    %c0_5 = arith.constant 0 : index
    %c0_6 = arith.constant 0 : index
    %c0_7 = arith.constant 0 : index
    %7 = vector.load %arg4[%c0_4, %c0_5, %c0_6, %c0_7] : memref<1x4x8x8xbf16, #tpu.memory_space<vmem>>, vector<1x1x8x8xbf16>
    %8 = vector.shape_cast %7 : vector<1x1x8x8xbf16> to vector<8x8xbf16>
    %c0_8 = arith.constant 0 : index
    %c0_9 = arith.constant 0 : index
    %c0_10 = arith.constant 0 : index
    %c0_11 = arith.constant 0 : index
    %9 = vector.load %arg5[%c0_8, %c0_9, %c0_10, %c0_11] : memref<1x4x8x8xbf16, #tpu.memory_space<vmem>>, vector<1x1x8x8xbf16>
    %10 = vector.shape_cast %9 : vector<1x1x8x8xbf16> to vector<8x8xbf16>
    %cst_12 = arith.constant dense<0.000000e+00> : vector<8x8xf32>
    %11 = tpu.matmul %6, %8, %cst_12 {dimension_numbers = #tpu.dot_dimension_numbers<[1], [1], [0], [0], [0, 0, 1, 0], [], []>} : vector<8x8xbf16>, vector<8x8xbf16>, vector<8x8xf32> -> vector<8x8xf32>
    %c0_13 = arith.constant 0 : index
    %c0_14 = arith.constant 0 : index
    %c0_15 = arith.constant 0 : index
    %12 = vector.load %arg7[%c0_13, %c0_14, %c0_15] : memref<4x8x1xf32, #tpu.memory_space<vmem>>, vector<1x8x1xf32>
    %13 = vector.shape_cast %12 : vector<1x8x1xf32> to vector<8x1xf32>
    %cst_16 = arith.constant dense<0xFF800000> : vector<8xf32>
    %14 = vector.multi_reduction <maximumf>, %11, %cst_16 [1] : vector<8x8xf32> to vector<8xf32>
    %15 = vector.shape_cast %14 : vector<8xf32> to vector<8x1xf32>
    %16 = arith.maximumf %13, %15 : vector<8x1xf32>
    %17 = arith.subf %13, %16 : vector<8x1xf32>
    %18 = math.exp %17 : vector<8x1xf32>
    %19 = vector.broadcast %16 : vector<8x1xf32> to vector<8x8xf32>
    %20 = arith.subf %11, %19 : vector<8x8xf32>
    %21 = math.exp %20 : vector<8x8xf32>
    %c0_17 = arith.constant 0 : index
    %c0_18 = arith.constant 0 : index
    %c0_19 = arith.constant 0 : index
    %22 = vector.load %arg8[%c0_17, %c0_18, %c0_19] : memref<4x8x1xf32, #tpu.memory_space<vmem>>, vector<1x8x1xf32>
    %23 = vector.shape_cast %22 : vector<1x8x1xf32> to vector<8x1xf32>
    %24 = arith.mulf %18, %23 : vector<8x1xf32>
    %cst_20 = arith.constant dense<0.000000e+00> : vector<8xf32>
    %25 = vector.multi_reduction <add>, %21, %cst_20 [1] : vector<8x8xf32> to vector<8xf32>
    %26 = vector.shape_cast %25 : vector<8xf32> to vector<8x1xf32>
    %27 = arith.addf %24, %26 : vector<8x1xf32>
    %c0_21 = arith.constant 0 : index
    %c0_22 = arith.constant 0 : index
    %c0_23 = arith.constant 0 : index
    %28 = vector.load %arg8[%c0_21, %c0_22, %c0_23] : memref<4x8x1xf32, #tpu.memory_space<vmem>>, vector<1x8x1xf32>
    %29 = vector.shape_cast %28 : vector<1x8x1xf32> to vector<8x1xf32>
    %30 = vector.shape_cast %27 : vector<8x1xf32> to vector<1x8x1xf32>
    tpu.vector_store %arg8[%c0_21, %c0_22, %c0_23], %30 {strides = array<i32>} : memref<4x8x1xf32, #tpu.memory_space<vmem>>, vector<1x8x1xf32>,
    %31 = arith.truncf %21 : vector<8x8xf32> to vector<8x8xbf16>
    %cst_24 = arith.constant dense<0.000000e+00> : vector<8x8xf32>
    %32 = tpu.matmul %31, %10, %cst_24 {dimension_numbers = #tpu.dot_dimension_numbers<[1], [0], [0], [1], [0, 0, 1, 1], [], []>} : vector<8x8xbf16>, vector<8x8xbf16>, vector<8x8xf32> -> vector<8x8xf32>
    %c0_25 = arith.constant 0 : index
    %c0_26 = arith.constant 0 : index
    %33 = vector.load %arg9[%c0_25, %c0_26] : memref<8x32xf32, #tpu.memory_space<vmem>>, vector<8x8xf32>
    %34 = vector.broadcast %18 : vector<8x1xf32> to vector<8x8xf32>
    %35 = arith.mulf %34, %33 : vector<8x8xf32>
    %36 = arith.addf %35, %32 : vector<8x8xf32>
    %c0_27 = arith.constant 0 : index
    %c0_28 = arith.constant 0 : index
    %37 = vector.load %arg9[%c0_27, %c0_28] : memref<8x32xf32, #tpu.memory_space<vmem>>, vector<8x8xf32>
    tpu.vector_store %arg9[%c0_27, %c0_28], %36 {strides = array<i32>} : memref<8x32xf32, #tpu.memory_space<vmem>>, vector<8x8xf32>,
    %c0_29 = arith.constant 0 : index
    %c0_30 = arith.constant 0 : index
    %c0_31 = arith.constant 0 : index
    %38 = vector.load %arg7[%c0_29, %c0_30, %c0_31] : memref<4x8x1xf32, #tpu.memory_space<vmem>>, vector<1x8x1xf32>
    %39 = vector.shape_cast %38 : vector<1x8x1xf32> to vector<8x1xf32>
    %40 = vector.shape_cast %16 : vector<8x1xf32> to vector<1x8x1xf32>
    tpu.vector_store %arg7[%c0_29, %c0_30, %c0_31], %40 {strides = array<i32>} : memref<4x8x1xf32, #tpu.memory_space<vmem>>, vector<1x8x1xf32>,
    %c0_32 = arith.constant 0 : index
    %c1 = arith.constant 1 : index
    %c0_33 = arith.constant 0 : index
    %c0_34 = arith.constant 0 : index
    %41 = vector.load %arg3[%c0_32, %c1, %c0_33, %c0_34] : memref<1x4x8x8xbf16, #tpu.memory_space<vmem>>, vector<1x1x8x8xbf16>
    %42 = vector.shape_cast %41 : vector<1x1x8x8xbf16> to vector<8x8xbf16>
    %cst_35 = arith.constant 3.535160e-01 : bf16
    %43 = vector.broadcast %cst_35 : bf16 to vector<8x8xbf16>
    %44 = arith.mulf %42, %43 : vector<8x8xbf16>
    %c0_36 = arith.constant 0 : index
    %c1_37 = arith.constant 1 : index
    %c0_38 = arith.constant 0 : index
    %c0_39 = arith.constant 0 : index
    %45 = vector.load %arg4[%c0_36, %c1_37, %c0_38, %c0_39] : memref<1x4x8x8xbf16, #tpu.memory_space<vmem>>, vector<1x1x8x8xbf16>
    %46 = vector.shape_cast %45 : vector<1x1x8x8xbf16> to vector<8x8xbf16>
    %c0_40 = arith.constant 0 : index
    %c1_41 = arith.constant 1 : index
    %c0_42 = arith.constant 0 : index
    %c0_43 = arith.constant 0 : index
    %47 = vector.load %arg5[%c0_40, %c1_41, %c0_42, %c0_43] : memref<1x4x8x8xbf16, #tpu.memory_space<vmem>>, vector<1x1x8x8xbf16>
    %48 = vector.shape_cast %47 : vector<1x1x8x8xbf16> to vector<8x8xbf16>
    %cst_44 = arith.constant dense<0.000000e+00> : vector<8x8xf32>
    %49 = tpu.matmul %44, %46, %cst_44 {dimension_numbers = #tpu.dot_dimension_numbers<[1], [1], [0], [0], [0, 0, 1, 0], [], []>} : vector<8x8xbf16>, vector<8x8xbf16>, vector<8x8xf32> -> vector<8x8xf32>
    %c1_45 = arith.constant 1 : index
    %c0_46 = arith.constant 0 : index
    %c0_47 = arith.constant 0 : index
    %50 = vector.load %arg7[%c1_45, %c0_46, %c0_47] : memref<4x8x1xf32, #tpu.memory_space<vmem>>, vector<1x8x1xf32>
    %51 = vector.shape_cast %50 : vector<1x8x1xf32> to vector<8x1xf32>
    %cst_48 = arith.constant dense<0xFF800000> : vector<8xf32>
    %52 = vector.multi_reduction <maximumf>, %49, %cst_48 [1] : vector<8x8xf32> to vector<8xf32>
    %53 = vector.shape_cast %52 : vector<8xf32> to vector<8x1xf32>
    %54 = arith.maximumf %51, %53 : vector<8x1xf32>
    %55 = arith.subf %51, %54 : vector<8x1xf32>
    %56 = math.exp %55 : vector<8x1xf32>
    %57 = vector.broadcast %54 : vector<8x1xf32> to vector<8x8xf32>
    %58 = arith.subf %49, %57 : vector<8x8xf32>
    %59 = math.exp %58 : vector<8x8xf32>
    %c1_49 = arith.constant 1 : index
    %c0_50 = arith.constant 0 : index
    %c0_51 = arith.constant 0 : index
    %60 = vector.load %arg8[%c1_49, %c0_50, %c0_51] : memref<4x8x1xf32, #tpu.memory_space<vmem>>, vector<1x8x1xf32>
    %61 = vector.shape_cast %60 : vector<1x8x1xf32> to vector<8x1xf32>
    %62 = arith.mulf %56, %61 : vector<8x1xf32>
    %cst_52 = arith.constant dense<0.000000e+00> : vector<8xf32>
    %63 = vector.multi_reduction <add>, %59, %cst_52 [1] : vector<8x8xf32> to vector<8xf32>
    %64 = vector.shape_cast %63 : vector<8xf32> to vector<8x1xf32>
    %65 = arith.addf %62, %64 : vector<8x1xf32>
    %c1_53 = arith.constant 1 : index
    %c0_54 = arith.constant 0 : index
    %c0_55 = arith.constant 0 : index
    %66 = vector.load %arg8[%c1_53, %c0_54, %c0_55] : memref<4x8x1xf32, #tpu.memory_space<vmem>>, vector<1x8x1xf32>
    %67 = vector.shape_cast %66 : vector<1x8x1xf32> to vector<8x1xf32>
    %68 = vector.shape_cast %65 : vector<8x1xf32> to vector<1x8x1xf32>
    tpu.vector_store %arg8[%c1_53, %c0_54, %c0_55], %68 {strides = array<i32>} : memref<4x8x1xf32, #tpu.memory_space<vmem>>, vector<1x8x1xf32>,
    %69 = arith.truncf %59 : vector<8x8xf32> to vector<8x8xbf16>
    %cst_56 = arith.constant dense<0.000000e+00> : vector<8x8xf32>
    %70 = tpu.matmul %69, %48, %cst_56 {dimension_numbers = #tpu.dot_dimension_numbers<[1], [0], [0], [1], [0, 0, 1, 1], [], []>} : vector<8x8xbf16>, vector<8x8xbf16>, vector<8x8xf32> -> vector<8x8xf32>
    %c0_57 = arith.constant 0 : index
    %c8 = arith.constant 8 : index
    %71 = vector.load %arg9[%c0_57, %c8] : memref<8x32xf32, #tpu.memory_space<vmem>>, vector<8x8xf32>
    %72 = vector.broadcast %56 : vector<8x1xf32> to vector<8x8xf32>
    %73 = arith.mulf %72, %71 : vector<8x8xf32>
    %74 = arith.addf %73, %70 : vector<8x8xf32>
    %c0_58 = arith.constant 0 : index
    %c8_59 = arith.constant 8 : index
    %75 = vector.load %arg9[%c0_58, %c8_59] : memref<8x32xf32, #tpu.memory_space<vmem>>, vector<8x8xf32>
    tpu.vector_store %arg9[%c0_58, %c8_59], %74 {strides = array<i32>} : memref<8x32xf32, #tpu.memory_space<vmem>>, vector<8x8xf32>,
    %c1_60 = arith.constant 1 : index
    %c0_61 = arith.constant 0 : index
    %c0_62 = arith.constant 0 : index
    %76 = vector.load %arg7[%c1_60, %c0_61, %c0_62] : memref<4x8x1xf32, #tpu.memory_space<vmem>>, vector<1x8x1xf32>
    %77 = vector.shape_cast %76 : vector<1x8x1xf32> to vector<8x1xf32>
    %78 = vector.shape_cast %54 : vector<8x1xf32> to vector<1x8x1xf32>
    tpu.vector_store %arg7[%c1_60, %c0_61, %c0_62], %78 {strides = array<i32>} : memref<4x8x1xf32, #tpu.memory_space<vmem>>, vector<1x8x1xf32>,
    %c0_63 = arith.constant 0 : index
    %c2 = arith.constant 2 : index
    %c0_64 = arith.constant 0 : index
    %c0_65 = arith.constant 0 : index
    %79 = vector.load %arg3[%c0_63, %c2, %c0_64, %c0_65] : memref<1x4x8x8xbf16, #tpu.memory_space<vmem>>, vector<1x1x8x8xbf16>
    %80 = vector.shape_cast %79 : vector<1x1x8x8xbf16> to vector<8x8xbf16>
    %cst_66 = arith.constant 3.535160e-01 : bf16
    %81 = vector.broadcast %cst_66 : bf16 to vector<8x8xbf16>
    %82 = arith.mulf %80, %81 : vector<8x8xbf16>
    %c0_67 = arith.constant 0 : index
    %c2_68 = arith.constant 2 : index
    %c0_69 = arith.constant 0 : index
    %c0_70 = arith.constant 0 : index
    %83 = vector.load %arg4[%c0_67, %c2_68, %c0_69, %c0_70] : memref<1x4x8x8xbf16, #tpu.memory_space<vmem>>, vector<1x1x8x8xbf16>
    %84 = vector.shape_cast %83 : vector<1x1x8x8xbf16> to vector<8x8xbf16>
    %c0_71 = arith.constant 0 : index
    %c2_72 = arith.constant 2 : index
    %c0_73 = arith.constant 0 : index
    %c0_74 = arith.constant 0 : index
    %85 = vector.load %arg5[%c0_71, %c2_72, %c0_73, %c0_74] : memref<1x4x8x8xbf16, #tpu.memory_space<vmem>>, vector<1x1x8x8xbf16>
    %86 = vector.shape_cast %85 : vector<1x1x8x8xbf16> to vector<8x8xbf16>
    %cst_75 = arith.constant dense<0.000000e+00> : vector<8x8xf32>
    %87 = tpu.matmul %82, %84, %cst_75 {dimension_numbers = #tpu.dot_dimension_numbers<[1], [1], [0], [0], [0, 0, 1, 0], [], []>} : vector<8x8xbf16>, vector<8x8xbf16>, vector<8x8xf32> -> vector<8x8xf32>
    %c2_76 = arith.constant 2 : index
    %c0_77 = arith.constant 0 : index
    %c0_78 = arith.constant 0 : index
    %88 = vector.load %arg7[%c2_76, %c0_77, %c0_78] : memref<4x8x1xf32, #tpu.memory_space<vmem>>, vector<1x8x1xf32>
    %89 = vector.shape_cast %88 : vector<1x8x1xf32> to vector<8x1xf32>
    %cst_79 = arith.constant dense<0xFF800000> : vector<8xf32>
    %90 = vector.multi_reduction <maximumf>, %87, %cst_79 [1] : vector<8x8xf32> to vector<8xf32>
    %91 = vector.shape_cast %90 : vector<8xf32> to vector<8x1xf32>
    %92 = arith.maximumf %89, %91 : vector<8x1xf32>
    %93 = arith.subf %89, %92 : vector<8x1xf32>
    %94 = math.exp %93 : vector<8x1xf32>
    %95 = vector.broadcast %92 : vector<8x1xf32> to vector<8x8xf32>
    %96 = arith.subf %87, %95 : vector<8x8xf32>
    %97 = math.exp %96 : vector<8x8xf32>
    %c2_80 = arith.constant 2 : index
    %c0_81 = arith.constant 0 : index
    %c0_82 = arith.constant 0 : index
    %98 = vector.load %arg8[%c2_80, %c0_81, %c0_82] : memref<4x8x1xf32, #tpu.memory_space<vmem>>, vector<1x8x1xf32>
    %99 = vector.shape_cast %98 : vector<1x8x1xf32> to vector<8x1xf32>
    %100 = arith.mulf %94, %99 : vector<8x1xf32>
    %cst_83 = arith.constant dense<0.000000e+00> : vector<8xf32>
    %101 = vector.multi_reduction <add>, %97, %cst_83 [1] : vector<8x8xf32> to vector<8xf32>
    %102 = vector.shape_cast %101 : vector<8xf32> to vector<8x1xf32>
    %103 = arith.addf %100, %102 : vector<8x1xf32>
    %c2_84 = arith.constant 2 : index
    %c0_85 = arith.constant 0 : index
    %c0_86 = arith.constant 0 : index
    %104 = vector.load %arg8[%c2_84, %c0_85, %c0_86] : memref<4x8x1xf32, #tpu.memory_space<vmem>>, vector<1x8x1xf32>
    %105 = vector.shape_cast %104 : vector<1x8x1xf32> to vector<8x1xf32>
    %106 = vector.shape_cast %103 : vector<8x1xf32> to vector<1x8x1xf32>
    tpu.vector_store %arg8[%c2_84, %c0_85, %c0_86], %106 {strides = array<i32>} : memref<4x8x1xf32, #tpu.memory_space<vmem>>, vector<1x8x1xf32>,
    %107 = arith.truncf %97 : vector<8x8xf32> to vector<8x8xbf16>
    %cst_87 = arith.constant dense<0.000000e+00> : vector<8x8xf32>
    %108 = tpu.matmul %107, %86, %cst_87 {dimension_numbers = #tpu.dot_dimension_numbers<[1], [0], [0], [1], [0, 0, 1, 1], [], []>} : vector<8x8xbf16>, vector<8x8xbf16>, vector<8x8xf32> -> vector<8x8xf32>
    %c0_88 = arith.constant 0 : index
    %c16 = arith.constant 16 : index
    %109 = vector.load %arg9[%c0_88, %c16] : memref<8x32xf32, #tpu.memory_space<vmem>>, vector<8x8xf32>
    %110 = vector.broadcast %94 : vector<8x1xf32> to vector<8x8xf32>
    %111 = arith.mulf %110, %109 : vector<8x8xf32>
    %112 = arith.addf %111, %108 : vector<8x8xf32>
    %c0_89 = arith.constant 0 : index
    %c16_90 = arith.constant 16 : index
    %113 = vector.load %arg9[%c0_89, %c16_90] : memref<8x32xf32, #tpu.memory_space<vmem>>, vector<8x8xf32>
    tpu.vector_store %arg9[%c0_89, %c16_90], %112 {strides = array<i32>} : memref<8x32xf32, #tpu.memory_space<vmem>>, vector<8x8xf32>,
    %c2_91 = arith.constant 2 : index
    %c0_92 = arith.constant 0 : index
    %c0_93 = arith.constant 0 : index
    %114 = vector.load %arg7[%c2_91, %c0_92, %c0_93] : memref<4x8x1xf32, #tpu.memory_space<vmem>>, vector<1x8x1xf32>
    %115 = vector.shape_cast %114 : vector<1x8x1xf32> to vector<8x1xf32>
    %116 = vector.shape_cast %92 : vector<8x1xf32> to vector<1x8x1xf32>
    tpu.vector_store %arg7[%c2_91, %c0_92, %c0_93], %116 {strides = array<i32>} : memref<4x8x1xf32, #tpu.memory_space<vmem>>, vector<1x8x1xf32>,
    %c0_94 = arith.constant 0 : index
    %c3 = arith.constant 3 : index
    %c0_95 = arith.constant 0 : index
    %c0_96 = arith.constant 0 : index
    %117 = vector.load %arg3[%c0_94, %c3, %c0_95, %c0_96] : memref<1x4x8x8xbf16, #tpu.memory_space<vmem>>, vector<1x1x8x8xbf16>
    %118 = vector.shape_cast %117 : vector<1x1x8x8xbf16> to vector<8x8xbf16>
    %cst_97 = arith.constant 3.535160e-01 : bf16
    %119 = vector.broadcast %cst_97 : bf16 to vector<8x8xbf16>
    %120 = arith.mulf %118, %119 : vector<8x8xbf16>
    %c0_98 = arith.constant 0 : index
    %c3_99 = arith.constant 3 : index
    %c0_100 = arith.constant 0 : index
    %c0_101 = arith.constant 0 : index
    %121 = vector.load %arg4[%c0_98, %c3_99, %c0_100, %c0_101] : memref<1x4x8x8xbf16, #tpu.memory_space<vmem>>, vector<1x1x8x8xbf16>
    %122 = vector.shape_cast %121 : vector<1x1x8x8xbf16> to vector<8x8xbf16>
    %c0_102 = arith.constant 0 : index
    %c3_103 = arith.constant 3 : index
    %c0_104 = arith.constant 0 : index
    %c0_105 = arith.constant 0 : index
    %123 = vector.load %arg5[%c0_102, %c3_103, %c0_104, %c0_105] : memref<1x4x8x8xbf16, #tpu.memory_space<vmem>>, vector<1x1x8x8xbf16>
    %124 = vector.shape_cast %123 : vector<1x1x8x8xbf16> to vector<8x8xbf16>
    %cst_106 = arith.constant dense<0.000000e+00> : vector<8x8xf32>
    %125 = tpu.matmul %120, %122, %cst_106 {dimension_numbers = #tpu.dot_dimension_numbers<[1], [1], [0], [0], [0, 0, 1, 0], [], []>} : vector<8x8xbf16>, vector<8x8xbf16>, vector<8x8xf32> -> vector<8x8xf32>
    %c3_107 = arith.constant 3 : index
    %c0_108 = arith.constant 0 : index
    %c0_109 = arith.constant 0 : index
    %126 = vector.load %arg7[%c3_107, %c0_108, %c0_109] : memref<4x8x1xf32, #tpu.memory_space<vmem>>, vector<1x8x1xf32>
    %127 = vector.shape_cast %126 : vector<1x8x1xf32> to vector<8x1xf32>
    %cst_110 = arith.constant dense<0xFF800000> : vector<8xf32>
    %128 = vector.multi_reduction <maximumf>, %125, %cst_110 [1] : vector<8x8xf32> to vector<8xf32>
    %129 = vector.shape_cast %128 : vector<8xf32> to vector<8x1xf32>
    %130 = arith.maximumf %127, %129 : vector<8x1xf32>
    %131 = arith.subf %127, %130 : vector<8x1xf32>
    %132 = math.exp %131 : vector<8x1xf32>
    %133 = vector.broadcast %130 : vector<8x1xf32> to vector<8x8xf32>
    %134 = arith.subf %125, %133 : vector<8x8xf32>
    %135 = math.exp %134 : vector<8x8xf32>
    %c3_111 = arith.constant 3 : index
    %c0_112 = arith.constant 0 : index
    %c0_113 = arith.constant 0 : index
    %136 = vector.load %arg8[%c3_111, %c0_112, %c0_113] : memref<4x8x1xf32, #tpu.memory_space<vmem>>, vector<1x8x1xf32>
    %137 = vector.shape_cast %136 : vector<1x8x1xf32> to vector<8x1xf32>
    %138 = arith.mulf %132, %137 : vector<8x1xf32>
    %cst_114 = arith.constant dense<0.000000e+00> : vector<8xf32>
    %139 = vector.multi_reduction <add>, %135, %cst_114 [1] : vector<8x8xf32> to vector<8xf32>
    %140 = vector.shape_cast %139 : vector<8xf32> to vector<8x1xf32>
    %141 = arith.addf %138, %140 : vector<8x1xf32>
    %c3_115 = arith.constant 3 : index
    %c0_116 = arith.constant 0 : index
    %c0_117 = arith.constant 0 : index
    %142 = vector.load %arg8[%c3_115, %c0_116, %c0_117] : memref<4x8x1xf32, #tpu.memory_space<vmem>>, vector<1x8x1xf32>
    %143 = vector.shape_cast %142 : vector<1x8x1xf32> to vector<8x1xf32>
    %144 = vector.shape_cast %141 : vector<8x1xf32> to vector<1x8x1xf32>
    tpu.vector_store %arg8[%c3_115, %c0_116, %c0_117], %144 {strides = array<i32>} : memref<4x8x1xf32, #tpu.memory_space<vmem>>, vector<1x8x1xf32>,
    %145 = arith.truncf %135 : vector<8x8xf32> to vector<8x8xbf16>
    %cst_118 = arith.constant dense<0.000000e+00> : vector<8x8xf32>
    %146 = tpu.matmul %145, %124, %cst_118 {dimension_numbers = #tpu.dot_dimension_numbers<[1], [0], [0], [1], [0, 0, 1, 1], [], []>} : vector<8x8xbf16>, vector<8x8xbf16>, vector<8x8xf32> -> vector<8x8xf32>
    %c0_119 = arith.constant 0 : index
    %c24 = arith.constant 24 : index
    %147 = vector.load %arg9[%c0_119, %c24] : memref<8x32xf32, #tpu.memory_space<vmem>>, vector<8x8xf32>
    %148 = vector.broadcast %132 : vector<8x1xf32> to vector<8x8xf32>
    %149 = arith.mulf %148, %147 : vector<8x8xf32>
    %150 = arith.addf %149, %146 : vector<8x8xf32>
    %c0_120 = arith.constant 0 : index
    %c24_121 = arith.constant 24 : index
    %151 = vector.load %arg9[%c0_120, %c24_121] : memref<8x32xf32, #tpu.memory_space<vmem>>, vector<8x8xf32>
    tpu.vector_store %arg9[%c0_120, %c24_121], %150 {strides = array<i32>} : memref<8x32xf32, #tpu.memory_space<vmem>>, vector<8x8xf32>,
    %c3_122 = arith.constant 3 : index
    %c0_123 = arith.constant 0 : index
    %c0_124 = arith.constant 0 : index
    %152 = vector.load %arg7[%c3_122, %c0_123, %c0_124] : memref<4x8x1xf32, #tpu.memory_space<vmem>>, vector<1x8x1xf32>
    %153 = vector.shape_cast %152 : vector<1x8x1xf32> to vector<8x1xf32>
    %154 = vector.shape_cast %130 : vector<8x1xf32> to vector<1x8x1xf32>
    tpu.vector_store %arg7[%c3_122, %c0_123, %c0_124], %154 {strides = array<i32>} : memref<4x8x1xf32, #tpu.memory_space<vmem>>, vector<1x8x1xf32>,
    %c0_i32_125 = arith.constant 0 : i32
    %155 = arith.cmpi eq, %arg2, %c0_i32_125 : i32
    %156 = arith.extui %155 : i1 to i32
    %c0_i32_126 = arith.constant 0 : i32
    %157 = arith.cmpi ne, %156, %c0_i32_126 : i32
    scf.if %157 {
      %c0_127 = arith.constant 0 : index
      %c0_128 = arith.constant 0 : index
      %c0_129 = arith.constant 0 : index
      %158 = vector.load %arg8[%c0_127, %c0_128, %c0_129] : memref<4x8x1xf32, #tpu.memory_space<vmem>>, vector<1x8x1xf32>
      %159 = vector.shape_cast %158 : vector<1x8x1xf32> to vector<8x1xf32>
      %160 = tpu.reciprocal %159 {approx = true} : vector<8x1xf32> -> vector<8x1xf32>
      %c0_130 = arith.constant 0 : index
      %c0_131 = arith.constant 0 : index
      %161 = vector.load %arg9[%c0_130, %c0_131] : memref<8x32xf32, #tpu.memory_space<vmem>>, vector<8x8xf32>
      %162 = vector.broadcast %160 : vector<8x1xf32> to vector<8x8xf32>
      %163 = arith.mulf %161, %162 : vector<8x8xf32>
      %c0_132 = arith.constant 0 : index
      %c0_133 = arith.constant 0 : index
      %164 = vector.load %arg9[%c0_132, %c0_133] : memref<8x32xf32, #tpu.memory_space<vmem>>, vector<8x8xf32>
      tpu.vector_store %arg9[%c0_132, %c0_133], %163 {strides = array<i32>} : memref<8x32xf32, #tpu.memory_space<vmem>>, vector<8x8xf32>,
      %c1_134 = arith.constant 1 : index
      %c0_135 = arith.constant 0 : index
      %c0_136 = arith.constant 0 : index
      %165 = vector.load %arg8[%c1_134, %c0_135, %c0_136] : memref<4x8x1xf32, #tpu.memory_space<vmem>>, vector<1x8x1xf32>
      %166 = vector.shape_cast %165 : vector<1x8x1xf32> to vector<8x1xf32>
      %167 = tpu.reciprocal %166 {approx = true} : vector<8x1xf32> -> vector<8x1xf32>
      %c0_137 = arith.constant 0 : index
      %c8_138 = arith.constant 8 : index
      %168 = vector.load %arg9[%c0_137, %c8_138] : memref<8x32xf32, #tpu.memory_space<vmem>>, vector<8x8xf32>
      %169 = vector.broadcast %167 : vector<8x1xf32> to vector<8x8xf32>
      %170 = arith.mulf %168, %169 : vector<8x8xf32>
      %c0_139 = arith.constant 0 : index
      %c8_140 = arith.constant 8 : index
      %171 = vector.load %arg9[%c0_139, %c8_140] : memref<8x32xf32, #tpu.memory_space<vmem>>, vector<8x8xf32>
      tpu.vector_store %arg9[%c0_139, %c8_140], %170 {strides = array<i32>} : memref<8x32xf32, #tpu.memory_space<vmem>>, vector<8x8xf32>,
      %c2_141 = arith.constant 2 : index
      %c0_142 = arith.constant 0 : index
      %c0_143 = arith.constant 0 : index
      %172 = vector.load %arg8[%c2_141, %c0_142, %c0_143] : memref<4x8x1xf32, #tpu.memory_space<vmem>>, vector<1x8x1xf32>
      %173 = vector.shape_cast %172 : vector<1x8x1xf32> to vector<8x1xf32>
      %174 = tpu.reciprocal %173 {approx = true} : vector<8x1xf32> -> vector<8x1xf32>
      %c0_144 = arith.constant 0 : index
      %c16_145 = arith.constant 16 : index
      %175 = vector.load %arg9[%c0_144, %c16_145] : memref<8x32xf32, #tpu.memory_space<vmem>>, vector<8x8xf32>
      %176 = vector.broadcast %174 : vector<8x1xf32> to vector<8x8xf32>
      %177 = arith.mulf %175, %176 : vector<8x8xf32>
      %c0_146 = arith.constant 0 : index
      %c16_147 = arith.constant 16 : index
      %178 = vector.load %arg9[%c0_146, %c16_147] : memref<8x32xf32, #tpu.memory_space<vmem>>, vector<8x8xf32>
      tpu.vector_store %arg9[%c0_146, %c16_147], %177 {strides = array<i32>} : memref<8x32xf32, #tpu.memory_space<vmem>>, vector<8x8xf32>,
      %c3_148 = arith.constant 3 : index
      %c0_149 = arith.constant 0 : index
      %c0_150 = arith.constant 0 : index
      %179 = vector.load %arg8[%c3_148, %c0_149, %c0_150] : memref<4x8x1xf32, #tpu.memory_space<vmem>>, vector<1x8x1xf32>
      %180 = vector.shape_cast %179 : vector<1x8x1xf32> to vector<8x1xf32>
      %181 = tpu.reciprocal %180 {approx = true} : vector<8x1xf32> -> vector<8x1xf32>
      %c0_151 = arith.constant 0 : index
      %c24_152 = arith.constant 24 : index
      %182 = vector.load %arg9[%c0_151, %c24_152] : memref<8x32xf32, #tpu.memory_space<vmem>>, vector<8x8xf32>
      %183 = vector.broadcast %181 : vector<8x1xf32> to vector<8x8xf32>
      %184 = arith.mulf %182, %183 : vector<8x8xf32>
      %c0_153 = arith.constant 0 : index
      %c24_154 = arith.constant 24 : index
      %185 = vector.load %arg9[%c0_153, %c24_154] : memref<8x32xf32, #tpu.memory_space<vmem>>, vector<8x8xf32>
      tpu.vector_store %arg9[%c0_153, %c24_154], %184 {strides = array<i32>} : memref<8x32xf32, #tpu.memory_space<vmem>>, vector<8x8xf32>,
      %c0_155 = arith.constant 0 : index
      %c0_156 = arith.constant 0 : index
      %186 = vector.load %arg9[%c0_155, %c0_156] : memref<8x32xf32, #tpu.memory_space<vmem>>, vector<8x32xf32>
      %187 = arith.truncf %186 : vector<8x32xf32> to vector<8x32xbf16>
      %c0_157 = arith.constant 0 : index
      %c0_158 = arith.constant 0 : index
      %c0_159 = arith.constant 0 : index
      %188 = vector.load %arg6[%c0_157, %c0_158, %c0_159] : memref<1x8x32xbf16, #tpu.memory_space<vmem>>, vector<1x8x32xbf16>
      %189 = vector.shape_cast %188 : vector<1x8x32xbf16> to vector<8x32xbf16>
      %190 = vector.shape_cast %187 : vector<8x32xbf16> to vector<1x8x32xbf16>
      tpu.vector_store %arg6[%c0_157, %c0_158, %c0_159], %190 {strides = array<i32>} : memref<1x8x32xbf16, #tpu.memory_space<vmem>>, vector<1x8x32xbf16>,
    } else {
    }
    return
  }
  func.func @transform_0(%arg0: i32, %arg1: i32, %arg2: i32) -> (i32, i32, i32, i32) {
    %c0_i32 = arith.constant 0 : i32
    %c0_i32_0 = arith.constant 0 : i32
    %c0_i32_1 = arith.constant 0 : i32
    return %arg0, %c0_i32, %arg1, %c0_i32_0 : i32, i32, i32, i32
  }
  func.func @transform_1(%arg0: i32, %arg1: i32, %arg2: i32) -> (i32, i32, i32, i32) {
    %c0_i32 = arith.constant 0 : i32
    %c0_i32_0 = arith.constant 0 : i32
    %c0_i32_1 = arith.constant 0 : i32
    return %arg0, %c0_i32, %arg2, %c0_i32_0 : i32, i32, i32, i32
  }
  func.func @transform_2(%arg0: i32, %arg1: i32, %arg2: i32) -> (i32, i32, i32, i32) {
    %c0_i32 = arith.constant 0 : i32
    %c0_i32_0 = arith.constant 0 : i32
    %c0_i32_1 = arith.constant 0 : i32
    return %arg0, %c0_i32, %arg2, %c0_i32_0 : i32, i32, i32, i32
  }
  func.func @transform_3(%arg0: i32, %arg1: i32, %arg2: i32) -> (i32, i32, i32) {
    %c0_i32 = arith.constant 0 : i32
    %c0_i32_0 = arith.constant 0 : i32
    return %arg0, %arg1, %c0_i32 : i32, i32, i32
  }
}

module attributes {stable_mosaic.version = 11 : i64} {
  func.func @_ln_matmul_bias_kernel(%arg0: i32, %arg1: memref<16x32xf32, #tpu.memory_space<vmem>>, %arg2: memref<1x32xf32, #tpu.memory_space<vmem>>, %arg3: memref<1x32xf32, #tpu.memory_space<vmem>>, %arg4: memref<32x64xbf16, #tpu.memory_space<vmem>>, %arg5: memref<1x64xf32, #tpu.memory_space<vmem>>, %arg6: memref<16x64xf32, #tpu.memory_space<vmem>>) attributes {dimension_semantics = [#tpu.dimension_semantics<parallel>], iteration_bounds = array<i64: 1>, scalar_prefetch = 0 : i64, scratch_operands = 0 : i64, tpu.core_type = #tpu.core_type<tc>, window_params = [{transform_indices = @transform_0, window_bounds = array<i64: 16, 32>}, {pipeline_mode = #tpu.pipeline_mode<synchronous>, transform_indices = @transform_1, window_bounds = array<i64: 1, 32>}, {pipeline_mode = #tpu.pipeline_mode<synchronous>, transform_indices = @transform_2, window_bounds = array<i64: 1, 32>}, {pipeline_mode = #tpu.pipeline_mode<synchronous>, transform_indices = @transform_3, window_bounds = array<i64: 32, 64>}, {pipeline_mode = #tpu.pipeline_mode<synchronous>, transform_indices = @transform_4, window_bounds = array<i64: 1, 64>}, {transform_indices = @transform_5, window_bounds = array<i64: 16, 64>}]} {
    %c0 = arith.constant 0 : index
    %c0_0 = arith.constant 0 : index
    %0 = vector.load %arg1[%c0, %c0_0] : memref<16x32xf32, #tpu.memory_space<vmem>>, vector<16x32xf32>
    %cst = arith.constant dense<0.000000e+00> : vector<16xf32>
    %1 = vector.multi_reduction <add>, %0, %cst [1] : vector<16x32xf32> to vector<16xf32>
    %2 = vector.shape_cast %1 : vector<16xf32> to vector<16x1xf32>
    %cst_1 = arith.constant 3.200000e+01 : f32
    %3 = vector.broadcast %cst_1 : f32 to vector<16x1xf32>
    %4 = arith.divf %2, %3 : vector<16x1xf32>
    %5 = vector.broadcast %4 : vector<16x1xf32> to vector<16x32xf32>
    %6 = arith.subf %0, %5 : vector<16x32xf32>
    %7 = arith.mulf %6, %6 : vector<16x32xf32>
    %cst_2 = arith.constant dense<0.000000e+00> : vector<16xf32>
    %8 = vector.multi_reduction <add>, %7, %cst_2 [1] : vector<16x32xf32> to vector<16xf32>
    %9 = vector.shape_cast %8 : vector<16xf32> to vector<16x1xf32>
    %cst_3 = arith.constant 3.200000e+01 : f32
    %10 = vector.broadcast %cst_3 : f32 to vector<16x1xf32>
    %11 = arith.divf %9, %10 : vector<16x1xf32>
    %cst_4 = arith.constant 9.99999974E-6 : f32
    %12 = vector.broadcast %cst_4 : f32 to vector<16x1xf32>
    %13 = arith.addf %11, %12 : vector<16x1xf32>
    %14 = math.rsqrt %13 : vector<16x1xf32>
    %15 = vector.broadcast %14 : vector<16x1xf32> to vector<16x32xf32>
    %16 = arith.mulf %6, %15 : vector<16x32xf32>
    %c0_5 = arith.constant 0 : index
    %c0_6 = arith.constant 0 : index
    %17 = vector.load %arg2[%c0_5, %c0_6] : memref<1x32xf32, #tpu.memory_space<vmem>>, vector<1x32xf32>
    %18 = vector.broadcast %17 : vector<1x32xf32> to vector<16x32xf32>
    %19 = arith.mulf %16, %18 : vector<16x32xf32>
    %c0_7 = arith.constant 0 : index
    %c0_8 = arith.constant 0 : index
    %20 = vector.load %arg3[%c0_7, %c0_8] : memref<1x32xf32, #tpu.memory_space<vmem>>, vector<1x32xf32>
    %21 = vector.broadcast %20 : vector<1x32xf32> to vector<16x32xf32>
    %22 = arith.addf %19, %21 : vector<16x32xf32>
    %23 = arith.truncf %22 : vector<16x32xf32> to vector<16x32xbf16>
    %c0_9 = arith.constant 0 : index
    %c0_10 = arith.constant 0 : index
    %24 = vector.load %arg4[%c0_9, %c0_10] : memref<32x64xbf16, #tpu.memory_space<vmem>>, vector<32x64xbf16>
    %cst_11 = arith.constant dense<0.000000e+00> : vector<16x64xf32>
    %25 = tpu.matmul %23, %24, %cst_11 {dimension_numbers = #tpu.dot_dimension_numbers<[1], [0], [0], [1], [0, 0, 1, 1], [], []>} : vector<16x32xbf16>, vector<32x64xbf16>, vector<16x64xf32> -> vector<16x64xf32>
    %c0_12 = arith.constant 0 : index
    %c0_13 = arith.constant 0 : index
    %26 = vector.load %arg5[%c0_12, %c0_13] : memref<1x64xf32, #tpu.memory_space<vmem>>, vector<1x64xf32>
    %27 = vector.broadcast %26 : vector<1x64xf32> to vector<16x64xf32>
    %28 = arith.addf %25, %27 : vector<16x64xf32>
    %c0_14 = arith.constant 0 : index
    %c0_15 = arith.constant 0 : index
    %29 = vector.load %arg6[%c0_14, %c0_15] : memref<16x64xf32, #tpu.memory_space<vmem>>, vector<16x64xf32>
    tpu.vector_store %arg6[%c0_14, %c0_15], %28 {strides = array<i32>} : memref<16x64xf32, #tpu.memory_space<vmem>>, vector<16x64xf32>,
    return
  }
  func.func @transform_0(%arg0: i32) -> (i32, i32) {
    %c0_i32 = arith.constant 0 : i32
    %c0_i32_0 = arith.constant 0 : i32
    return %arg0, %c0_i32 : i32, i32
  }
  func.func @transform_1(%arg0: i32) -> (i32, i32) {
    %c0_i32 = arith.constant 0 : i32
    %c0_i32_0 = arith.constant 0 : i32
    %c0_i32_1 = arith.constant 0 : i32
    return %c0_i32, %c0_i32_0 : i32, i32
  }
  func.func @transform_2(%arg0: i32) -> (i32, i32) {
    %c0_i32 = arith.constant 0 : i32
    %c0_i32_0 = arith.constant 0 : i32
    %c0_i32_1 = arith.constant 0 : i32
    return %c0_i32, %c0_i32_0 : i32, i32
  }
  func.func @transform_3(%arg0: i32) -> (i32, i32) {
    %c0_i32 = arith.constant 0 : i32
    %c0_i32_0 = arith.constant 0 : i32
    %c0_i32_1 = arith.constant 0 : i32
    return %c0_i32, %c0_i32_0 : i32, i32
  }
  func.func @transform_4(%arg0: i32) -> (i32, i32) {
    %c0_i32 = arith.constant 0 : i32
    %c0_i32_0 = arith.constant 0 : i32
    %c0_i32_1 = arith.constant 0 : i32
    return %c0_i32, %c0_i32_0 : i32, i32
  }
  func.func @transform_5(%arg0: i32) -> (i32, i32) {
    %c0_i32 = arith.constant 0 : i32
    %c0_i32_0 = arith.constant 0 : i32
    return %arg0, %c0_i32 : i32, i32
  }
}

</mosaic_0001>

<bundles_post_ra>
// kernel: pure_vit_forward.10
= control target key start
LH: loop header
LB: loop body
LE: loop exit
PB: predicated region body
PF: predicated region fallthrough
CT: control target
= control target key end

     0   :  { %v138_v0 = vmov 0.0   ;;  %vm139_vm0 = vmmov 0   ;;  %vm57_vm1 = vcmask 523264   ;;  %vm102_vm2 = vcmask 261120   ;;  %s187_s1 = inlined_call_operand.vmem [shape: bf16[64,32], index: 1, kind: input, shape index: {}]   ;;  %s188_s0 = inlined_call_operand.vmem [shape: f32[16,64], index: 0, kind: input, shape index: {}]   ;;  %s189_s2 = inlined_call_operand.vmem [shape: f32[1,32], index: 2, kind: input, shape index: {}]   ;;  %s190_s3 = inlined_call_operand.vmem [shape: f32[16,32], index: 3, kind: output, shape index: {}]  }
   0x1   :  { %120 = vmatprep.subr.bf16.mxu0 %v138_v0  ;;  %v134_v1 = vld [vmem:[%s187_s1] sm:$0xff]   ;;  %128 = vmatprep.mubr.msk.bf16.mxu0 %vm139_vm0, %v138_v0  ;;  %v135_v2 = vld [vmem:[%s187_s1 + $0x8] sm:$0xff]   ;;  %v136_v3 = vld [vmem:[%s187_s1 + $0x10] sm:$0xff]  }
   0x2   :  { %121 = vmatpush3.bf16.msra.mxu0 %v134_v1  ;;  %v137_v4 = vld [vmem:[%s187_s1 + $0x18] sm:$0xff]   ;;  %v15_v5 = vld [vmem:[%s188_s0] sm:$0xff]  ;;  %v16_v6 = vld [vmem:[%s188_s0 + $0x8] sm:$0xff] }
   0x3   :  { %122 = vmatprep.subr.bf16.mxu0 %v138_v0  ;;  %v17_v7 = vpack.c.bf16 %v16_v6, %v15_v5  ;;  %v109_v8 = vld [vmem:[%s189_s2] ss:$0 sm:$0xff] }
   0x6   :  { %123 = vmatpush3.bf16.msra.mxu0 %v135_v2 }
   0x7   :  { %124 = vmatprep.subr.bf16.mxu0 %v138_v0 }
   0xa   :  { %125 = vmatpush3.bf16.msra.mxu0 %v136_v3 }
   0xb   :  { %126 = vmatprep.subr.bf16.mxu0 %v138_v0 }
   0xe   :  { %127 = vmatpush3.bf16.msra.mxu0 %v137_v4 }
  0x11   :  { %129 = vmatmul.mubr.msk.bf16.vlgmr.msra.gmra.mrb[0].mxu0 %vm57_vm1, %v17_v7 }
  0xe4   :  { %v95_v9 = vpop.f32.mrb[0].mxu0 }
  0xe5   :  { %v96_v10 = vadd.f32 %v109_v8, %v95_v9  ;;  %v130_v11 = vpop.f32.mrb[1].mxu0 }
  0xe6   :  { %v98_v12 = vpop.f32.mrb[2].mxu0 }
  0xe7   :  { %103 = vst.msk [vmem:[%s190_s3] sm:$0xff] %vm102_vm2, %v96_v10  ;;  %v99_v13 = vadd.f32 %v109_v8, %v98_v12  ;;  %v131_v14 = vpop.f32.mrb[3].mxu0 }
  0xe9   :  { %104 = vst.msk [vmem:[%s190_s3 + $0x8] sm:$0xff] %vm102_vm2, %v99_v13 }

// kernel: pure_vit_forward.11
= control target key start
LH: loop header
LB: loop body
LE: loop exit
PB: predicated region body
PF: predicated region fallthrough
CT: control target
= control target key end

     0   :  { %vm20_vm0 = vcmask 261120   ;;  %v170_v15 = vmov 0.0   ;;  %vm171_vm1 = vmmov 0   ;;  %vm135_vm2 = vcmask 781312   ;;  %s226_s0 = inlined_call_operand.vmem [shape: f32[16,32], index: 0, kind: input, shape index: {}]   ;;  %s227_s3 = inlined_call_operand.vmem [shape: bf16[32,96], index: 3, kind: input, shape index: {}]   ;;  %s228_s1 = inlined_call_operand.vmem [shape: f32[1,32], index: 1, kind: input, shape index: {}]   ;;  %s229_s2 = inlined_call_operand.vmem [shape: f32[1,32], index: 2, kind: input, shape index: {}]   ;;  %s230_s4 = inlined_call_operand.vmem [shape: bf16[16,96], index: 4, kind: output, shape index: {}]  }
   0x1   :  { %v18_v0 = vld [vmem:[%s226_s0] sm:$0xff]  ;;  %v19_v1 = vld [vmem:[%s226_s0 + $0x8] sm:$0xff]  ;;  %154 = vmatprep.subr.bf16.mxu0 %v170_v15  ;;  %158 = vmatprep.mubr.msk.bf16.mxu0 %vm171_vm1, %v170_v15 }
   0x2   :  { %v21_v2 = vsel %vm20_vm0, %v18_v0, 0.0  ;;  %v24_v3 = vsel %vm20_vm0, %v19_v1, 0.0  ;;  %v164_v14 = vld [vmem:[%s227_s3] sm:$0xff]   ;;  %v165_v16 = vld [vmem:[%s227_s3 + $0x8] sm:$0xff]  }
   0x3   :  { %22 = vadd.xlane.f32.xlu0 %v21_v2  ;;  %155 = vmatpush3.bf16.msra.mxu0 %v164_v14  ;;  %v142_v25 = vld [vmem:[%s228_s1] ss:$0 sm:$0xff] }
   0x4   :  { %156 = vmatprep.subr.bf16.mxu0 %v170_v15  ;;  %v143_v29 = vld [vmem:[%s229_s2] ss:$0 sm:$0xff] }
   0x7   :  { %25 = vadd.xlane.f32.xlu0 %v24_v3  ;;  %157 = vmatpush3.bf16.msra.mxu0 %v165_v16 }
  0x90   :  { %v23_v4 = vpop.xlane.xlu0 %22 }
  0x91   :  { %v28_v5 = vmul.f32 0.03125, %v23_v4 }
  0x93   :  { %v30_v6 = vsub.f32 %v18_v0, %v28_v5 }
  0x94   :  { %v26_v7 = vpop.xlane.xlu0 %25 }
  0x95   :  { %v29_v8 = vmul.f32 0.03125, %v26_v7  ;;  %v32_v9 = vmul.f32 %v30_v6, %v30_v6 }
  0x97   :  { %v31_v10 = vsub.f32 %v19_v1, %v29_v8  ;;  %v34_v11 = vsel %vm20_vm0, %v32_v9, 0.0 }
  0x98   :  { %35 = vadd.xlane.f32.xlu1 %v34_v11 }
  0x99   :  { %v33_v12 = vmul.f32 %v31_v10, %v31_v10 }
  0x9b   :  { %v37_v13 = vsel %vm20_vm0, %v33_v12, 0.0 }
  0x9c   :  { %38 = vadd.xlane.f32.xlu1 %v37_v13 }
 0x125   :  { %v36_v17 = vpop.xlane.xlu1 %35 }
 0x126   :  { %v40_v18 = vmul.f32 0.03125, %v36_v17 }
 0x128   :  { %v42_v19 = vadd.f32 1e-05, %v40_v18 }
 0x129   :  { %v39_v20 = vpop.xlane.xlu1 %38 }
 0x12a   :  { %166 = vrsqrt.f32 %v42_v19  ;;  %v41_v21 = vmul.f32 0.03125, %v39_v20 }
 0x12c   :  { %v43_v22 = vadd.f32 1e-05, %v41_v21 }
 0x12e   :  { %168 = vrsqrt.f32 %v43_v22 }
 0x134   :  { %v167_v23 = vpop.eup %166 }
 0x135   :  { %v46_v24 = vmul.f32 %v167_v23, %v30_v6 }
 0x137   :  { %v55_v28 = vmul.f32 %v142_v25, %v46_v24 }
 0x138   :  { %v169_v26 = vpop.eup %168 }
 0x139   :  { %v47_v27 = vmul.f32 %v169_v26, %v31_v10  ;;  %v64_v31 = vadd.f32 %v143_v29, %v55_v28 }
 0x13b   :  { %v56_v30 = vmul.f32 %v142_v25, %v47_v27 }
 0x13d   :  { %v65_v32 = vadd.f32 %v143_v29, %v56_v30 }
 0x13f   :  { %v66_v33 = vpack.c.bf16 %v65_v32, %v64_v31 }
 0x141   :  { %159 = vmatmul.mubr.msk.bf16.vlgmr.msra.gmra.mrb[0].mxu0 %vm20_vm0, %v66_v33 }
 0x214   :  { %v120_v34 = vpop.f32.mrb[0].mxu0 }
 0x215   :  { %v149_v35 = vpack.c.bf16 %v120_v34, %v120_v34  ;;  %v160_v36 = vpop.f32.mrb[1].mxu0 }
 0x216   :  { %v123_v37 = vpop.f32.mrb[2].mxu0 }
 0x217   :  { %136 = vst.msk [vmem:[%s230_s4] sm:$0xf] %vm135_vm2, %v149_v35  ;;  %v150_v38 = vpack.c.bf16 %v123_v37, %v123_v37  ;;  %v161_v39 = vpop.f32.mrb[3].mxu0 }
 0x219   :  { %137 = vst.msk [vmem:[%s230_s4 + $0x4] sm:$0xf] %vm135_vm2, %v150_v38 }

// kernel: pure_vit_forward.13
= control target key start
LH: loop header
LB: loop body
LE: loop exit
PB: predicated region body
PF: predicated region fallthrough
CT: control target
= control target key end

     0   :  { %v124_v0 = vmov 0.0   ;;  %vm125_vm0 = vmmov 0   ;;  %vm48_vm1 = vcmask 261120   ;;  %s178_s2 = inlined_call_operand.vmem [shape: bf16[32,32], index: 2, kind: input, shape index: {}]   ;;  %s179_s0 = inlined_call_operand.vmem [shape: bf16[16,32], index: 0, kind: input, shape index: {}]   ;;  %s180_s3 = inlined_call_operand.vmem [shape: f32[1,32], index: 3, kind: input, shape index: {}]   ;;  %s181_s1 = inlined_call_operand.vmem [shape: f32[16,32], index: 1, kind: input, shape index: {}]   ;;  %s182_s4 = inlined_call_operand.vmem [shape: f32[16,32], index: 4, kind: output, shape index: {}]  }
   0x1   :  { %111 = vmatprep.subr.bf16.mxu0 %v124_v0  ;;  %v121_v1 = vld [vmem:[%s178_s2] sm:$0xff]   ;;  %115 = vmatprep.mubr.msk.bf16.mxu0 %vm125_vm0, %v124_v0  ;;  %v122_v2 = vld [vmem:[%s178_s2 + $0x8] sm:$0xff]  }
   0x2   :  { %112 = vmatpush3.bf16.msra.mxu0 %v121_v1  ;;  %v123_v3 = vld [vmem:[%s179_s0] sm:$0xff]   ;;  %v94_v10 = vld [vmem:[%s181_s1 + $0x8] sm:$0xff] }
   0x3   :  { %113 = vmatprep.subr.bf16.mxu0 %v124_v0  ;;  %v103_v4 = vld [vmem:[%s180_s3] ss:$0 sm:$0xff] }
   0x4   :  { %v93_v6 = vld [vmem:[%s181_s1] sm:$0xff] }
   0x6   :  { %114 = vmatpush3.bf16.msra.mxu0 %v122_v2 }
   0x9   :  { %116 = vmatmul.mubr.msk.bf16.vlgmr.msra.gmra.mrb[0].mxu0 %vm48_vm1, %v123_v3 }
  0xdc   :  { %v86_v5 = vpop.f32.mrb[0].mxu0 }
  0xdd   :  { %v87_v7 = vadd.f32 %v103_v4, %v86_v5  ;;  %v117_v8 = vpop.f32.mrb[1].mxu0 }
  0xde   :  { %v89_v9 = vpop.f32.mrb[2].mxu0 }
  0xdf   :  { %v95_v11 = vadd.f32 %v93_v6, %v87_v7  ;;  %v90_v12 = vadd.f32 %v103_v4, %v89_v9  ;;  %v118_v13 = vpop.f32.mrb[3].mxu0 }
  0xe1   :  { %97 = vst.msk [vmem:[%s182_s4] sm:$0xff] %vm48_vm1, %v95_v11  ;;  %v96_v14 = vadd.f32 %v94_v10, %v90_v12 }
  0xe3   :  { %98 = vst.msk [vmem:[%s182_s4 + $0x8] sm:$0xff] %vm48_vm1, %v96_v14 }

// kernel: pure_vit_forward.14
= control target key start
LH: loop header
LB: loop body
LE: loop exit
PB: predicated region body
PF: predicated region fallthrough
CT: control target
= control target key end

     0   :  { %vm29_vm0 = vcmask 261120   ;;  %v312_v15 = vmov 0.0   ;;  %vm313_vm1 = vmmov 0   ;;  %vm194_vm2 = vcmask 523264   ;;  %s413_s0 = inlined_call_operand.vmem [shape: f32[16,32], index: 0, kind: input, shape index: {}]   ;;  %s414_s3 = inlined_call_operand.vmem [shape: bf16[32,64], index: 3, kind: input, shape index: {}]   ;;  %s415_s1 = inlined_call_operand.vmem [shape: f32[1,32], index: 1, kind: input, shape index: {}]   ;;  %s416_s2 = inlined_call_operand.vmem [shape: f32[1,32], index: 2, kind: input, shape index: {}]   ;;  %s417_s5 = inlined_call_operand.vmem [shape: bf16[64,32], index: 5, kind: input, shape index: {}]   ;;  %s418_s4 = inlined_call_operand.vmem [shape: f32[1,64], index: 4, kind: input, shape index: {}]   ;;  %s419_s6 = inlined_call_operand.vmem [shape: f32[1,32], index: 6, kind: input, shape index: {}]   ;;  %s420_s7 = inlined_call_operand.vmem [shape: f32[16,32], index: 7, kind: output, shape index: {}]  }
   0x1   :  { %v357_v0 = vld [vmem:[%s413_s0] sm:$0xff]  ;;  %v362_v1 = vld [vmem:[%s413_s0 + $0x8] sm:$0xff]  ;;  %276 = vmatprep.subr.bf16.mxu0 %v312_v15  ;;  %284 = vmatprep.subr.bf16.mxu1 %v312_v15  ;;  %v302_v36 = vld [vmem:[%s417_s5 + $0x10] sm:$0xff]  }
   0x2   :  { %v30_v2 = vsel %vm29_vm0, %v357_v0, 0.0  ;;  %v33_v3 = vsel %vm29_vm0, %v362_v1, 0.0  ;;  %v298_v14 = vld [vmem:[%s414_s3] sm:$0xff]   ;;  %v299_v16 = vld [vmem:[%s414_s3 + $0x8] sm:$0xff]   ;;  %280 = vmatprep.mubr.msk.bf16.mxu0 %vm313_vm1, %v312_v15  ;;  %292 = vmatprep.mubr.msk.bf16.mxu1 %vm313_vm1, %v312_v15  ;;  %v303_v37 = vld [vmem:[%s417_s5 + $0x18] sm:$0xff]  }
   0x3   :  { %31 = vadd.xlane.f32.xlu0 %v30_v2  ;;  %277 = vmatpush3.bf16.msra.mxu0 %v298_v14  ;;  %v256_v25 = vld [vmem:[%s415_s1] ss:$0 sm:$0xff]  ;;  %v301_v35 = vld [vmem:[%s417_s5 + $0x8] sm:$0xff]  }
   0x4   :  { %278 = vmatprep.subr.bf16.mxu0 %v312_v15  ;;  %v257_v29 = vld [vmem:[%s416_s2] ss:$0 sm:$0xff] }
   0x5   :  { %v300_v34 = vld [vmem:[%s417_s5] sm:$0xff]  }
   0x6   :  { %285 = vmatpush3.bf16.msra.mxu1 %v300_v34  ;;  %v258_v38 = vld [vmem:[%s418_s4] ss:$0 sm:$0xff] }
   0x7   :  { %34 = vadd.xlane.f32.xlu0 %v33_v3  ;;  %279 = vmatpush3.bf16.msra.mxu0 %v299_v16  ;;  %v267_v3 = vld [vmem:[%s419_s6] ss:$0 sm:$0xff] }
   0x8   :  { %286 = vmatprep.subr.bf16.mxu1 %v312_v15 }
   0xa   :  { %287 = vmatpush3.bf16.msra.mxu1 %v301_v35 }
   0xb   :  { %288 = vmatprep.subr.bf16.mxu1 %v312_v15 }
   0xe   :  { %289 = vmatpush3.bf16.msra.mxu1 %v302_v36 }
   0xf   :  { %290 = vmatprep.subr.bf16.mxu1 %v312_v15 }
  0x12   :  { %291 = vmatpush3.bf16.msra.mxu1 %v303_v37 }
  0x90   :  { %v32_v4 = vpop.xlane.xlu0 %31 }
  0x91   :  { %v37_v5 = vmul.f32 0.03125, %v32_v4 }
  0x93   :  { %v39_v6 = vsub.f32 %v357_v0, %v37_v5 }
  0x94   :  { %v35_v7 = vpop.xlane.xlu0 %34 }
  0x95   :  { %v38_v8 = vmul.f32 0.03125, %v35_v7  ;;  %v41_v9 = vmul.f32 %v39_v6, %v39_v6 }
  0x97   :  { %v40_v10 = vsub.f32 %v362_v1, %v38_v8  ;;  %v43_v11 = vsel %vm29_vm0, %v41_v9, 0.0 }
  0x98   :  { %44 = vadd.xlane.f32.xlu1 %v43_v11 }
  0x99   :  { %v42_v12 = vmul.f32 %v40_v10, %v40_v10 }
  0x9b   :  { %v46_v13 = vsel %vm29_vm0, %v42_v12, 0.0 }
  0x9c   :  { %47 = vadd.xlane.f32.xlu1 %v46_v13 }
 0x125   :  { %v45_v17 = vpop.xlane.xlu1 %44 }
 0x126   :  { %v49_v18 = vmul.f32 0.03125, %v45_v17 }
 0x128   :  { %v51_v19 = vadd.f32 1e-05, %v49_v18 }
 0x129   :  { %v48_v20 = vpop.xlane.xlu1 %47 }
 0x12a   :  { %304 = vrsqrt.f32 %v51_v19  ;;  %v50_v21 = vmul.f32 0.03125, %v48_v20 }
 0x12c   :  { %v52_v22 = vadd.f32 1e-05, %v50_v21 }
 0x12e   :  { %306 = vrsqrt.f32 %v52_v22 }
 0x134   :  { %v305_v23 = vpop.eup %304 }
 0x135   :  { %v55_v24 = vmul.f32 %v305_v23, %v39_v6 }
 0x137   :  { %v64_v28 = vmul.f32 %v256_v25, %v55_v24 }
 0x138   :  { %v307_v26 = vpop.eup %306 }
 0x139   :  { %v56_v27 = vmul.f32 %v307_v26, %v40_v10  ;;  %v73_v31 = vadd.f32 %v257_v29, %v64_v28 }
 0x13b   :  { %v65_v30 = vmul.f32 %v256_v25, %v56_v27 }
 0x13d   :  { %v74_v32 = vadd.f32 %v257_v29, %v65_v30 }
 0x13f   :  { %v75_v33 = vpack.c.bf16 %v74_v32, %v73_v31 }
 0x141   :  { %281 = vmatmul.mubr.msk.bf16.vlgmr.msra.gmra.mrb[0].mxu0 %vm29_vm0, %v75_v33 }
 0x214   :  { %v136_v39 = vpop.f32.mrb[0].mxu0 }
 0x215   :  { %v137_v40 = vadd.f32 %v258_v38, %v136_v39  ;;  %v282_v41 = vpop.f32.mrb[1].mxu0 }
 0x216   :  { %v139_v42 = vpop.f32.mrb[2].mxu0 }
 0x217   :  { %v143_v43 = vmul.f32 %v137_v40, %v137_v40  ;;  %v140_v44 = vadd.f32 %v258_v38, %v139_v42  ;;  %v283_v45 = vpop.f32.mrb[3].mxu0 }
 0x219   :  { %v145_v46 = vmul.f32 %v143_v43, %v137_v40  ;;  %v144_v47 = vmul.f32 %v140_v44, %v140_v44 }
 0x21b   :  { %v147_v48 = vmul.f32 0.044715, %v145_v46  ;;  %v146_v49 = vmul.f32 %v144_v47, %v140_v44 }
 0x21d   :  { %v149_v50 = vadd.f32 %v147_v48, %v137_v40  ;;  %v148_v51 = vmul.f32 0.044715, %v146_v49 }
 0x21f   :  { %v151_v52 = vmul.f32 0.7978846, %v149_v50  ;;  %v150_v53 = vadd.f32 %v148_v51, %v140_v44 }
 0x221   :  { %308 = vtanh.f32 %v151_v52  ;;  %v152_v54 = vmul.f32 0.7978846, %v150_v53 }
 0x223   :  { %310 = vtanh.f32 %v152_v54 }
 0x22b   :  { %v309_v55 = vpop.eup %308 }
 0x22c   :  { %v155_v56 = vadd.f32 1.0, %v309_v55 }
 0x22d   :  { %v311_v57 = vpop.eup %310 }
 0x22e   :  { %v157_v58 = vmul.f32 0.5, %v155_v56  ;;  %v156_v59 = vadd.f32 1.0, %v311_v57 }
 0x230   :  { %v158_v60 = vmul.f32 0.5, %v156_v59  ;;  %v159_v61 = vmul.f32 %v157_v58, %v137_v40 }
 0x232   :  { %v160_v62 = vmul.f32 %v158_v60, %v140_v44 }
 0x234   :  { %v161_v63 = vpack.c.bf16 %v160_v62, %v159_v61 }
 0x236   :  { %293 = vmatmul.mubr.msk.bf16.vlgmr.msra.gmra.mrb[0].mxu1 %vm194_vm2, %v161_v63 }
 0x309   :  { %v232_v2 = vpop.f32.mrb[0].mxu1 }
 0x30a   :  { %v239_v4 = vadd.f32 %v232_v2, %v357_v0  ;;  %v294_v5 = vpop.f32.mrb[1].mxu1 }
 0x30b   :  { %v235_v6 = vpop.f32.mrb[2].mxu1 }
 0x30c   :  { %v248_v7 = vadd.f32 %v267_v3, %v239_v4  ;;  %v240_v8 = vadd.f32 %v235_v6, %v362_v1  ;;  %v295_v9 = vpop.f32.mrb[3].mxu1 }
 0x30e   :  { %250 = vst.msk [vmem:[%s420_s7] sm:$0xff] %vm29_vm0, %v248_v7  ;;  %v249_v10 = vadd.f32 %v267_v3, %v240_v8 }
 0x310   :  { %251 = vst.msk [vmem:[%s420_s7 + $0x8] sm:$0xff] %vm29_vm0, %v249_v10 }

// kernel: pure_vit_forward.19
= control target key start
LH: loop header
LB: loop body
LE: loop exit
PB: predicated region body
PF: predicated region fallthrough
CT: control target
= control target key end

     0   :  { %vm23_vm0 = vcmask 261120   ;;  %v169_v15 = vmov 0.0   ;;  %vm170_vm1 = vmmov 0   ;;  %vm137_vm2 = vcmask 523264   ;;  %s233_s0 = inlined_call_operand.vmem [shape: f32[16,32], index: 0, kind: input, shape index: {}]   ;;  %s234_s3 = inlined_call_operand.vmem [shape: bf16[32,64], index: 3, kind: input, shape index: {}]   ;;  %s235_s1 = inlined_call_operand.vmem [shape: f32[1,32], index: 1, kind: input, shape index: {}]   ;;  %s236_s2 = inlined_call_operand.vmem [shape: f32[1,32], index: 2, kind: input, shape index: {}]   ;;  %s237_s4 = inlined_call_operand.vmem [shape: f32[1,64], index: 4, kind: input, shape index: {}]   ;;  %s238_s5 = inlined_call_operand.vmem [shape: f32[16,64], index: 5, kind: output, shape index: {}]  }
   0x1   :  { %v21_v0 = vld [vmem:[%s233_s0] sm:$0xff]  ;;  %v22_v1 = vld [vmem:[%s233_s0 + $0x8] sm:$0xff]  ;;  %153 = vmatprep.subr.bf16.mxu0 %v169_v15  ;;  %157 = vmatprep.mubr.msk.bf16.mxu0 %vm170_vm1, %v169_v15 }
   0x2   :  { %v24_v2 = vsel %vm23_vm0, %v21_v0, 0.0  ;;  %v27_v3 = vsel %vm23_vm0, %v22_v1, 0.0  ;;  %v163_v14 = vld [vmem:[%s234_s3] sm:$0xff]   ;;  %v164_v16 = vld [vmem:[%s234_s3 + $0x8] sm:$0xff]  }
   0x3   :  { %25 = vadd.xlane.f32.xlu0 %v24_v2  ;;  %154 = vmatpush3.bf16.msra.mxu0 %v163_v14  ;;  %v144_v25 = vld [vmem:[%s235_s1] ss:$0 sm:$0xff] }
   0x4   :  { %155 = vmatprep.subr.bf16.mxu0 %v169_v15  ;;  %v145_v29 = vld [vmem:[%s236_s2] ss:$0 sm:$0xff] }
   0x5   :  { %v146_v34 = vld [vmem:[%s237_s4] ss:$0 sm:$0xff] }
   0x7   :  { %28 = vadd.xlane.f32.xlu0 %v27_v3  ;;  %156 = vmatpush3.bf16.msra.mxu0 %v164_v16 }
  0x90   :  { %v26_v4 = vpop.xlane.xlu0 %25 }
  0x91   :  { %v31_v5 = vmul.f32 0.03125, %v26_v4 }
  0x93   :  { %v33_v6 = vsub.f32 %v21_v0, %v31_v5 }
  0x94   :  { %v29_v7 = vpop.xlane.xlu0 %28 }
  0x95   :  { %v32_v8 = vmul.f32 0.03125, %v29_v7  ;;  %v35_v9 = vmul.f32 %v33_v6, %v33_v6 }
  0x97   :  { %v34_v10 = vsub.f32 %v22_v1, %v32_v8  ;;  %v37_v11 = vsel %vm23_vm0, %v35_v9, 0.0 }
  0x98   :  { %38 = vadd.xlane.f32.xlu1 %v37_v11 }
  0x99   :  { %v36_v12 = vmul.f32 %v34_v10, %v34_v10 }
  0x9b   :  { %v40_v13 = vsel %vm23_vm0, %v36_v12, 0.0 }
  0x9c   :  { %41 = vadd.xlane.f32.xlu1 %v40_v13 }
 0x125   :  { %v39_v17 = vpop.xlane.xlu1 %38 }
 0x126   :  { %v43_v18 = vmul.f32 0.03125, %v39_v17 }
 0x128   :  { %v45_v19 = vadd.f32 1e-05, %v43_v18 }
 0x129   :  { %v42_v20 = vpop.xlane.xlu1 %41 }
 0x12a   :  { %165 = vrsqrt.f32 %v45_v19  ;;  %v44_v21 = vmul.f32 0.03125, %v42_v20 }
 0x12c   :  { %v46_v22 = vadd.f32 1e-05, %v44_v21 }
 0x12e   :  { %167 = vrsqrt.f32 %v46_v22 }
 0x134   :  { %v166_v23 = vpop.eup %165 }
 0x135   :  { %v49_v24 = vmul.f32 %v166_v23, %v33_v6 }
 0x137   :  { %v58_v28 = vmul.f32 %v144_v25, %v49_v24 }
 0x138   :  { %v168_v26 = vpop.eup %167 }
 0x139   :  { %v50_v27 = vmul.f32 %v168_v26, %v34_v10  ;;  %v67_v31 = vadd.f32 %v145_v29, %v58_v28 }
 0x13b   :  { %v59_v30 = vmul.f32 %v144_v25, %v50_v27 }
 0x13d   :  { %v68_v32 = vadd.f32 %v145_v29, %v59_v30 }
 0x13f   :  { %v69_v33 = vpack.c.bf16 %v68_v32, %v67_v31 }
 0x141   :  { %158 = vmatmul.mubr.msk.bf16.vlgmr.msra.gmra.mrb[0].mxu0 %vm23_vm0, %v69_v33 }
 0x214   :  { %v130_v35 = vpop.f32.mrb[0].mxu0 }
 0x215   :  { %v131_v36 = vadd.f32 %v146_v34, %v130_v35  ;;  %v159_v37 = vpop.f32.mrb[1].mxu0 }
 0x216   :  { %v133_v38 = vpop.f32.mrb[2].mxu0 }
 0x217   :  { %138 = vst.msk [vmem:[%s238_s5] sm:$0xff] %vm137_vm2, %v131_v36  ;;  %v134_v39 = vadd.f32 %v146_v34, %v133_v38  ;;  %v160_v40 = vpop.f32.mrb[3].mxu0 }
 0x219   :  { %139 = vst.msk [vmem:[%s238_s5 + $0x8] sm:$0xff] %vm137_vm2, %v134_v39 }

// kernel: pure_vit_forward.12
= control target key start
LH: loop header
LB: loop body
LE: loop exit
PB: predicated region body
PF: predicated region fallthrough
CT: control target
= control target key end

     0   :  { %s1208_s12 = smov 0   ;;  %s1210_s13 = smov 0   ;;  %s1364_s0 = inlined_call_operand.vmem [shape: bf16[2,4,8,8], index: 0, kind: input, shape index: {}]   ;;  %s1365_s1 = inlined_call_operand.vmem [shape: bf16[2,4,8,8], index: 1, kind: input, shape index: {}]   ;;  %s1366_s2 = inlined_call_operand.vmem [shape: bf16[2,4,8,8], index: 2, kind: input, shape index: {}]   ;;  %s1367_s3 = inlined_call_operand.vmem [shape: bf16[2,8,32], index: 3, kind: output, shape index: {}]  }
   0x1   :  { %s1212_s14 = smov 0  }
   0x2 LB: > { %s32_s15 = sadd.s32 1, %s1175_s13  ;;  %p1006_p0 = scmp.ge.s32.totalorder %s1179_s14, 1  ;;  %s1179_s14 = sphi %s1212_s14, %s13_s14   ;;  %s1175_s13 = sphi %s1210_s13, %s1369_s13   ;;  %s1171_s12 = sphi %s1208_s12, %s1368_s12  }
   0x3   : > { %p34_p1 = scmp.ge.s32.totalorder %s32_s15, 2  ;;  %p193_p2 = scmp.lt.s32.totalorder %s1179_s14, 3 }
   0x5   : > { %s1371_s15 = smov (%p34_p1, %s32_s15), 0  ;;  %p194_p3 = pnand %p1006_p0, %p193_p2 }
   0x6   : > { %p238_p4 = scmp.lt.s32.totalorder (!%p194_p3), %s1171_s12, 1  ;;  %v1181_v0 = vmov (!%p194_p3), 0.0   ;;  %vm1182_vm0 = vmmov (!%p194_p3), 0   ;;  %vm290_vm1 = vcmask (!%p194_p3), 64512   ;;  %vm275_vm2 = vcmask (!%p194_p3), 7168   ;;  %s1185_s26 = smov (!%p194_p3), 8  }
   0x7   : > { %197 = sbr.rel (%p194_p3) target bundleno = 1447 (0x5a7), region = 32  ;;  %1052 = vmatprep.subr.bf16.mxu0 (!%p194_p3), %v1181_v0  ;;  %1054 = vmatprep.mubr.msk.bf16.mxu0 (!%p194_p3), %vm1182_vm0, %v1181_v0  ;;  %v1183_v5 = vmov (!%p194_p3), -inf   ;;  %280 = vst.msk [vmem:[#allocation3] sm:$0xff] (!%p194_p3), %vm275_vm2, %v1181_v0  ;;  %281 = vst.msk [vmem:[#allocation3 + $0x8] sm:$0xff] (!%p194_p3), %vm275_vm2, %v1181_v0  ;;  %v1184_v11 = vmov (!%p194_p3), 0   ;;  %vm365_vm3 = vcmask (!%p194_p3), 1043456  }
   0x8   : > { %1058 = vmatprep.subr.bf16.mxu1 (!%p194_p3), %v1181_v0  ;;  %1060 = vmatprep.mubr.msk.bf16.mxu1 (!%p194_p3), %vm1182_vm0, %v1181_v0  ;;  %276 = vst.msk [vmem:[#allocation2] sm:$0xff] (!%p194_p3), %vm275_vm2, %v1183_v5  ;;  %277 = vst.msk [vmem:[#allocation2 + $0x8] sm:$0xff] (!%p194_p3), %vm275_vm2, %v1183_v5  ;;  %vm284_vm4 = vcmask (!%p194_p3), 261120   ;;  %s1186_s27 = smov (!%p194_p3), 16   ;;  %s1187_s28 = smov (!%p194_p3), 24   ;;  %vm556_vm5 = vcmask (!%p194_p3), 130112  }
   0x9   : > { %278 = vst.msk [vmem:[#allocation2 + $0x10] sm:$0xff] (!%p194_p3), %vm275_vm2, %v1183_v5  ;;  %279 = vst.msk [vmem:[#allocation2 + $0x18] sm:$0xff] (!%p194_p3), %vm275_vm2, %v1183_v5  ;;  %1131 = vset.pattern.permute.xlu0 (!%p194_p3), %v1184_v11  ;;  %1132 = vset.pattern.permute.xlu1 (!%p194_p3), %v1184_v11  ;;  %vm696_vm6 = vcmask (!%p194_p3), 195712   ;;  %vm836_vm7 = vcmask (!%p194_p3), 261312   ;;  %vm884_vm8 = vcmask (!%p194_p3), 257024  }
   0xa   : > { %282 = vst.msk [vmem:[#allocation3 + $0x10] sm:$0xff] (!%p194_p3), %vm275_vm2, %v1181_v0  ;;  %283 = vst.msk [vmem:[#allocation3 + $0x18] sm:$0xff] (!%p194_p3), %vm275_vm2, %v1181_v0 }
   0xb   : > { %285 = vst.msk [vmem:[#allocation4] sm:$0xff] (!%p194_p3), %vm284_vm4, %v1181_v0 }
   0xe   : > { %s1373_s12 = smov (!%p238_p4, %s1171_s12), 1 }
   0xf   : > { %s1235_s16 = sshll.u32 %s1373_s12, 4  ;;  %v337_v12 = vld [vmem:[#allocation2] sm:$0xff]  ;;  %v473_v60 = vld [vmem:[#allocation2 + $0x8] sm:$0xff]  ;;  %s1013_s29 = sshll.u32 %s1373_s12, 2 }
  0x10   : > { %s1241_s19 = scalar_lea.vmem %s1364_s0, %s1235_s16  ;;  %s1247_s22 = scalar_lea.vmem %s1365_s1, %s1235_s16  ;;  %v613_v63 = vld [vmem:[#allocation2 + $0x10] sm:$0xff] }
  0x11   : > { %v288_v1 = vld [vmem:[%s1247_s22] sm:$0xf]  ;;  %s1274_s25 = scalar_lea.vmem %s1366_s2, %s1235_s16  ;;  %v1017_v23 = vld [vmem:[%s1247_s22 + $0x4] sm:$0xf]  ;;  %v1022_v28 = vld [vmem:[%s1247_s22 + $0x8] sm:$0xf]  ;;  %s268_s5 = scalar_lea.vmem %s1367_s3, %s1013_s29 }
  0x12   : > { %v295_v2 = vsel %vm290_vm1, %v288_v1, 0  ;;  %v286_v3 = vld [vmem:[%s1241_s19] sm:$0xf]  ;;  %v430_v26 = vsel %vm290_vm1, %v1017_v23, 0  ;;  %v1016_v27 = vld [vmem:[%s1241_s19 + $0x4] sm:$0xf] }
  0x13   : > { %1053 = vmatpush3.bf16.xpose.msra.mxu0 %v295_v2  ;;  %v287_v4 = vmul.bf16 1052065461, %v286_v3  ;;  %v289_v17 = vld [vmem:[%s1274_s25] sm:$0xf]  ;;  %v421_v29 = vmul.bf16 1052065461, %v1016_v27 }
  0x14   : > { %1070 = vmatprep.subr.bf16.mxu0 %v1181_v0  ;;  %v367_v18 = vsel %vm365_vm3, %v289_v17, 0  ;;  %v570_v30 = vsel %vm290_vm1, %v1022_v28, 0  ;;  %v1021_v31 = vld [vmem:[%s1241_s19 + $0x8] sm:$0xf]  ;;  %v1027_v32 = vld [vmem:[%s1247_s22 + $0xc] sm:$0xf] }
  0x15   : > { %1059 = vmatpush3.bf16.msra.mxu1 %v367_v18  ;;  %v561_v33 = vmul.bf16 1052065461, %v1021_v31  ;;  %v710_v34 = vsel %vm290_vm1, %v1027_v32, 0  ;;  %v1026_v35 = vld [vmem:[%s1241_s19 + $0xc] sm:$0xf]  ;;  %v409_v37 = vld [vmem:[#allocation4] sm:$0xff] }
  0x16   : > { %1064 = vmatprep.subr.bf16.mxu1 %v1181_v0  ;;  %v701_v36 = vmul.bf16 1052065461, %v1026_v35  ;;  %v1018_v5 = vld [vmem:[%s1274_s25 + $0x4] sm:$0xf] }
  0x1a   : > { %1055 = vmatmul.mubr.msk.bf16.vlgmr.msra.gmra.mrb[0].mxu0 %vm290_vm1, %v287_v4  ;;  %v1314_v4 = vld [vmem:[#allocation2 + $0x18] sm:$0xff] }
  0x1b   : > { %1072 = vmatprep.mubr.msk.bf16.mxu0 %vm1182_vm0, %v1181_v0 }
  0xed   : > { %v331_v6 = vpop.f32.mrb[0].mxu0 }
  0xee   : > { %v1056_v7 = vpop.f32.mrb[1].mxu0  ;;  %v338_v8 = vsel %vm290_vm1, %v331_v6, -inf }
  0xef   : > { %339 = vmax.xlane.f32.xlu0 %v338_v8  ;;  %v334_v9 = vpop.f32.mrb[2].mxu0  ;;  %v502_v7 = vsel %vm365_vm3, %v1018_v5, 0 }
  0xf0   : > { %v1057_v10 = vpop.f32.mrb[3].mxu0  ;;  %1071 = vmatpush3.bf16.msra.mxu0 %v502_v7 }
  0xf1   : > { %1082 = vmatprep.subr.bf16.mxu0 %v1181_v0 }
 0x17c   : > { %v340_v13 = vpop.xlane.xlu0 %339 }
 0x17d   : > { %v341_v14 = vmax.f32 %v337_v12, %v340_v13 }
 0x17f   : > { %v342_v15 = vsub.f32 %v337_v12, %v341_v14  ;;  %418 = vst.msk [vmem:[#allocation2] sm:$0xff] %vm275_vm2, %v341_v14  ;;  %347 = vperm.xlu0 %1131, %v341_v14  }
 0x181   : > { %v343_v16 = vmul.f32 1.442695, %v342_v15 }
 0x183   : > { %1133 = vpow2.f32 %v343_v16 }
 0x18d   : > { %v1280_v19 = vpop.eup %1133 }
 0x18e   : > { %412 = vperm.xlu0 %1131, %v1280_v19  }
 0x1fe   : > { %v348_v20 = vpop.permute.xlu0 %347 }
 0x1ff   : > { %v350_v21 = vsub.f32 %v331_v6, %v348_v20 }
 0x201   : > { %v351_v22 = vmul.f32 1.442695, %v350_v21  ;;  %v1023_v21 = vld [vmem:[%s1274_s25 + $0x8] sm:$0xf] }
 0x203   : > { %1135 = vpow2.f32 %v351_v22 }
 0x20d   : > { %v1284_v24 = vpop.eup %1135  ;;  %v413_v38 = vpop.permute.xlu0 %412 }
 0x20e   : > { %v361_v25 = vpack.c.bf16 %v1284_v24, %v1284_v24  ;;  %v415_v39 = vmul.f32 %v413_v38, %v409_v37  ;;  %v355_v11 = vsel %vm290_vm1, %v1284_v24, 0.0 }
 0x210   : > { %1061 = vmatmul.mubr.msk.bf16.vlgmr.msra.gmra.mrb[0].mxu1 %vm290_vm1, %v361_v25 }
 0x211   : > { %1065 = vmatpush3.bf16.xpose.msra.mxu1 %v430_v26  ;;  %1066 = vmatprep.mubr.msk.bf16.mxu1 %vm1182_vm0, %v1181_v0  ;;  %v642_v26 = vsel %vm365_vm3, %v1023_v21, 0 }
 0x212   : > { %1076 = vmatprep.subr.bf16.mxu1 %v1181_v0 }
 0x218   : > { %1067 = vmatmul.mubr.msk.bf16.vlgmr.msra.gmra.mrb[4].mxu1 %vm290_vm1, %v421_v29  ;;  %v1028_v29 = vld [vmem:[%s1274_s25 + $0xc] sm:$0xf] }
 0x219   : > { %1077 = vmatpush3.bf16.xpose.msra.mxu1 %v570_v30  ;;  %1078 = vmatprep.mubr.msk.bf16.mxu1 %vm1182_vm0, %v1181_v0 }
 0x21a   : > { %1088 = vmatprep.subr.bf16.mxu1 %v1181_v0 }
 0x220   : > { %1079 = vmatmul.mubr.msk.bf16.vlgmr.msra.gmra.mrb[8].mxu1 %vm290_vm1, %v561_v33  ;;  %v782_v33 = vsel %vm365_vm3, %v1028_v29, 0 }
 0x221   : > { %1089 = vmatpush3.bf16.xpose.msra.mxu1 %v710_v34  ;;  %1090 = vmatprep.mubr.msk.bf16.mxu1 %vm1182_vm0, %v1181_v0 }
 0x228   : > { %1091 = vmatmul.mubr.msk.bf16.vlgmr.msra.gmra.mrb[12].mxu1 %vm290_vm1, %v701_v36 }
 0x2e3   : > { %v403_v40 = vpop.f32.mrb[0].mxu1 }
 0x2e4   : > { %v416_v41 = vadd.f32 %v415_v39, %v403_v40  ;;  %v1062_v42 = vpop.f32.mrb[1].mxu1  ;;  %v353_v39 = vld [vmem:[#allocation3] sm:$0xff] }
 0x2e5   : > { %v406_v43 = vpop.f32.mrb[2].mxu1  ;;  %v354_v40 = vmul.f32 %v1280_v19, %v353_v39  ;;  %v770_v19 = vld [vmem:[#allocation3 + $0x18] sm:$0xff] }
 0x2e6   : > { %417 = vst.msk [vmem:[#allocation4] sm:$0xff] %vm290_vm1, %v416_v41  ;;  %v1063_v44 = vpop.f32.mrb[3].mxu1  ;;  %v490_v43 = vld [vmem:[#allocation3 + $0x8] sm:$0xff] }
 0x2eb   : > { %v466_v45 = vpop.f32.mrb[4].mxu1 }
 0x2ec   : > { %v1068_v46 = vpop.f32.mrb[5].mxu1  ;;  %v474_v47 = vsel %vm290_vm1, %v466_v45, -inf }
 0x2ed   : > { %475 = vmax.xlane.f32.xlu1 %v474_v47  ;;  %v469_v48 = vpop.f32.mrb[6].mxu1  ;;  %v630_v47 = vld [vmem:[#allocation3 + $0x10] sm:$0xff] }
 0x2ee   : > { %v1069_v49 = vpop.f32.mrb[7].mxu1 }
 0x2f3   : > { %v606_v50 = vpop.f32.mrb[8].mxu1 }
 0x2f4   : > { %v1080_v51 = vpop.f32.mrb[9].mxu1  ;;  %v614_v52 = vsel %vm290_vm1, %v606_v50, -inf }
 0x2f5   : > { %615 = vmax.xlane.f32.xlu1 %v614_v52  ;;  %v609_v53 = vpop.f32.mrb[10].mxu1 }
 0x2f6   : > { %v1081_v54 = vpop.f32.mrb[11].mxu1 }
 0x2fb   : > { %v746_v55 = vpop.f32.mrb[12].mxu1 }
 0x2fc   : > { %v754_v56 = vsel %vm290_vm1, %v746_v55, -inf  ;;  %v1092_v57 = vpop.f32.mrb[13].mxu1 }
 0x2fd   : > { %755 = vmax.xlane.f32.xlu1 %v754_v56  ;;  %v749_v58 = vpop.f32.mrb[14].mxu1 }
 0x2fe   : > { %v1093_v59 = vpop.f32.mrb[15].mxu1 }
 0x37a   : > { %v476_v61 = vpop.xlane.xlu1 %475 }
 0x37b   : > { %v477_v62 = vmax.f32 %v473_v60, %v476_v61 }
 0x37d   : > { %558 = vst.msk [vmem:[#allocation2 + $0x8] sm:$0xff] %vm275_vm2, %v477_v62  ;;  %483 = vperm.xlu1 %1132, %v477_v62   ;;  %v478_v10 = vsub.f32 %v473_v60, %v477_v62 }
 0x37f   : > { %v479_v12 = vmul.f32 1.442695, %v478_v10 }
 0x381   : > { %1137 = vpow2.f32 %v479_v12 }
 0x382   : > { %v616_v1 = vpop.xlane.xlu1 %615 }
 0x383   : > { %v617_v2 = vmax.f32 %v613_v63, %v616_v1 }
 0x385   : > { %v618_v3 = vsub.f32 %v613_v63, %v617_v2  ;;  %698 = vst.msk [vmem:[#allocation2 + $0x10] sm:$0xff] %vm275_vm2, %v617_v2  ;;  %623 = vperm.xlu1 %1132, %v617_v2  }
 0x387   : > { %v619_v37 = vmul.f32 1.442695, %v618_v3 }
 0x38a   : > { %v756_v6 = vpop.xlane.xlu1 %755 }
 0x38b   : > { %v757_v8 = vmax.f32 %v1314_v4, %v756_v6  ;;  %v1138_v13 = vpop.eup %1137 }
 0x38c   : > { %v491_v44 = vmul.f32 %v1138_v13, %v490_v43 }
 0x38d   : > { %v758_v9 = vsub.f32 %v1314_v4, %v757_v8  ;;  %838 = vst.msk [vmem:[#allocation2 + $0x18] sm:$0xff] %vm275_vm2, %v757_v8  ;;  %763 = vperm.xlu1 %1132, %v757_v8  }
 0x3b1   : > { %356 = vadd.xlane.f32.xlu1 %v355_v11 }
 0x3c2   : > { %547 = vperm.xlu1 %1132, %v1138_v13   ;;  %v544_v13 = vld [vmem:[#allocation4] sm:$0xff] }
 0x3fc   : > { %v484_v14 = vpop.permute.xlu1 %483 }
 0x3fd   : > { %v486_v15 = vsub.f32 %v466_v45, %v484_v14 }
 0x3ff   : > { %v487_v16 = vmul.f32 1.442695, %v486_v15 }
 0x401   : > { %1139 = vpow2.f32 %v487_v16 }
 0x404   : > { %v624_v17 = vpop.permute.xlu1 %623 }
 0x405   : > { %v626_v18 = vsub.f32 %v606_v50, %v624_v17 }
 0x407   : > { %v627_v20 = vmul.f32 1.442695, %v626_v18 }
 0x409   : > { %1141 = vpow2.f32 %v627_v20 }
 0x40b   : > { %v1140_v22 = vpop.eup %1139 }
 0x40c   : > { %v764_v23 = vpop.permute.xlu1 %763  ;;  %v492_v25 = vsel %vm290_vm1, %v1140_v22, 0.0  ;;  %v497_v24 = vpack.c.bf16 %v1140_v22, %v1140_v22 }
 0x40d   : > { %v766_v27 = vsub.f32 %v746_v55, %v764_v23  ;;  %493 = vadd.xlane.f32.xlu0 %v492_v25 }
 0x40e   : > { %1073 = vmatmul.mubr.msk.bf16.vlgmr.msra.gmra.mrb[4].mxu0 %vm290_vm1, %v497_v24 }
 0x40f   : > { %v767_v28 = vmul.f32 1.442695, %v766_v27  ;;  %1083 = vmatpush3.bf16.msra.mxu0 %v642_v26  ;;  %1084 = vmatprep.mubr.msk.bf16.mxu0 %vm1182_vm0, %v1181_v0 }
 0x410   : > { %1094 = vmatprep.subr.bf16.mxu0 %v1181_v0 }
 0x411   : > { %1143 = vpow2.f32 %v767_v28 }
 0x412   : > { %1145 = vpow2.f32 %v619_v37 }
 0x413   : > { %v1142_v30 = vpop.eup %1141 }
 0x414   : > { %v632_v31 = vsel %vm290_vm1, %v1142_v30, 0.0  ;;  %v637_v32 = vpack.c.bf16 %v1142_v30, %v1142_v30 }
 0x415   : > { %633 = vadd.xlane.f32.xlu0 %v632_v31 }
 0x416   : > { %1085 = vmatmul.mubr.msk.bf16.vlgmr.msra.gmra.mrb[8].mxu0 %vm290_vm1, %v637_v32 }
 0x417   : > { %1095 = vmatpush3.bf16.msra.mxu0 %v782_v33  ;;  %1096 = vmatprep.mubr.msk.bf16.mxu0 %vm1182_vm0, %v1181_v0  ;;  %v759_v0 = vmul.f32 1.442695, %v758_v9 }
 0x419   : > { %1147 = vpow2.f32 %v759_v0 }
 0x41b   : > { %v1144_v34 = vpop.eup %1143 }
 0x41c   : > { %v772_v35 = vsel %vm290_vm1, %v1144_v34, 0.0  ;;  %v777_v36 = vpack.c.bf16 %v1144_v34, %v1144_v34  ;;  %v1146_v38 = vpop.eup %1145 }
 0x41d   : > { %773 = vadd.xlane.f32.xlu0 %v772_v35  ;;  %v631_v48 = vmul.f32 %v1146_v38, %v630_v47 }
 0x41e   : > { %1097 = vmatmul.mubr.msk.bf16.vlgmr.msra.gmra.mrb[12].mxu0 %vm290_vm1, %v777_v36 }
 0x423   : > { %v1148_v51 = vpop.eup %1147 }
 0x424   : > { %v771_v52 = vmul.f32 %v1148_v51, %v770_v19 }
 0x433   : > { %687 = vperm.xlu0 %1131, %v1146_v38  }
 0x43e   : > { %v357_v41 = vpop.xlane.xlu1 %356 }
 0x43f   : > { %v358_v42 = vadd.f32 %v357_v41, %v354_v40 }
 0x441   : > { %360 = vst.msk [vmem:[#allocation3] sm:$0xff] %vm275_vm2, %v358_v42 }
 0x442   : > { %v548_v12 = vpop.permute.xlu1 %547 }
 0x443   : > { %v550_v14 = vmul.f32 %v548_v12, %v544_v13 }
 0x448   : > { %v842_v61 = vld [vmem:[#allocation3] sm:$0xff] }
 0x49a   : > { %v494_v45 = vpop.xlane.xlu0 %493 }
 0x49b   : > { %v495_v46 = vadd.f32 %v494_v45, %v491_v44 }
 0x49d   : > { %496 = vst.msk [vmem:[#allocation3 + $0x8] sm:$0xff] %vm275_vm2, %v495_v46 }
 0x4a2   : > { %v634_v49 = vpop.xlane.xlu0 %633 }
 0x4a3   : > { %v635_v50 = vadd.f32 %v634_v49, %v631_v48 }
 0x4a4   : > { %v852_v3 = vld [vmem:[#allocation3 + $0x8] sm:$0xff] }
 0x4a5   : > { %636 = vst.msk [vmem:[#allocation3 + $0x10] sm:$0xff] %vm275_vm2, %v635_v50 }
 0x4aa   : > { %v774_v53 = vpop.xlane.xlu0 %773 }
 0x4ab   : > { %v775_v54 = vadd.f32 %v774_v53, %v771_v52 }
 0x4ac   : > { %v862_v55 = vld [vmem:[#allocation3 + $0x10] sm:$0xff] }
 0x4ad   : > { %776 = vst.msk [vmem:[#allocation3 + $0x18] sm:$0xff] %vm275_vm2, %v775_v54  ;;  %1149 = vrcp.f32 %v862_v55 }
 0x4ae   : > { %1151 = vrcp.f32 %v842_v61 }
 0x4af   : > { %1153 = vrcp.f32 %v852_v3 }
 0x4b2   : > { %v688_v17 = vpop.permute.xlu0 %687 }
 0x4b4   : > { %v872_v4 = vld [vmem:[#allocation3 + $0x18] sm:$0xff] }
 0x4b5   : > { %1155 = vrcp.f32 %v872_v4 }
 0x4b7   : > { %v1150_v56 = vpop.eup %1149 }
 0x4b8   : > { %867 = vperm.xlu0 %1131, %v1150_v56   ;;  %v1152_v9 = vpop.eup %1151 }
 0x4b9   : > { %v1154_v10 = vpop.eup %1153 }
 0x4bf   : > { %v1156_v11 = vpop.eup %1155 }
 0x4e1   : > { %v538_v57 = vpop.f32.mrb[4].mxu0 }
 0x4e2   : > { %552 = vrot.lane.b32.xlu1 %v538_v57, %s1185_s26  ;;  %v1074_v58 = vpop.f32.mrb[5].mxu0 }
 0x4e3   : > { %v541_v59 = vpop.f32.mrb[6].mxu0 }
 0x4e4   : > { %v1075_v60 = vpop.f32.mrb[7].mxu0 }
 0x4e9   : > { %v678_v62 = vpop.f32.mrb[8].mxu0 }
 0x4ea   : > { %692 = vrot.lane.b32.xlu1 %v678_v62, %s1186_s27  ;;  %v1086_v63 = vpop.f32.mrb[9].mxu0 }
 0x4eb   : > { %v681_v1 = vpop.f32.mrb[10].mxu0 }
 0x4ec   : > { %v1087_v2 = vpop.f32.mrb[11].mxu0 }
 0x4ee   : > { %827 = vperm.xlu1 %1132, %v1148_v51  }
 0x4f1   : > { %v818_v5 = vpop.f32.mrb[12].mxu0 }
 0x4f2   : > { %832 = vrot.lane.b32.xlu1 %v818_v5, %s1187_s28  ;;  %v1098_v6 = vpop.f32.mrb[13].mxu0 }
 0x4f3   : > { %v821_v7 = vpop.f32.mrb[14].mxu0 }
 0x4f4   : > { %v1099_v8 = vpop.f32.mrb[15].mxu0 }
 0x4f6   : > { %847 = vperm.xlu1 %1132, %v1152_v9  }
 0x4fa   : > { %857 = vperm.xlu1 %1132, %v1154_v10  }
 0x4fe   : > { %877 = vperm.xlu1 %1132, %v1156_v11  }
 0x537   : > { %v868_v34 = vpop.permute.xlu0 %867 }
 0x554   : > { %v553_v15 = vpop.permute.xlu1 %552 }
 0x555   : > { %v555_v16 = vadd.f32 %v553_v15, %v550_v14 }
 0x557   : > { %557 = vst.msk [vmem:[#allocation4] sm:$0xff] %vm556_vm5, %v555_v16 }
 0x55c   : > { %v693_v21 = vpop.permute.xlu1 %692 }
 0x55e   : > { %v684_v18 = vld [vmem:[#allocation4] sm:$0xff] }
 0x55f   : > { %v690_v20 = vmul.f32 %v688_v17, %v684_v18 }
 0x561   : > { %v695_v22 = vadd.f32 %v693_v21, %v690_v20 }
 0x563   : > { %697 = vst.msk [vmem:[#allocation4] sm:$0xff] %vm696_vm6, %v695_v22 }
 0x56a   : > { %v824_v25 = vld [vmem:[#allocation4] sm:$0xff] }
 0x56d   : > { %v828_v23 = vpop.permute.xlu1 %827 }
 0x56e   : > { %v830_v24 = vmul.f32 %v828_v23, %v824_v25 }
 0x571   : > { %v833_v26 = vpop.permute.xlu1 %832 }
 0x572   : > { %v835_v27 = vadd.f32 %v833_v26, %v830_v24 }
 0x574   : > { %837 = vst.msk [vmem:[#allocation4] sm:$0xff] %vm836_vm7, %v835_v27 }
 0x575   : > { %v848_v29 = vpop.permute.xlu1 %847 }
 0x579   : > { %v858_v32 = vpop.permute.xlu1 %857 }
 0x57b   : > { %v844_v28 = vld [vmem:[#allocation4] sm:$0xff] }
 0x57c   : > { %v850_v30 = vmul.f32 %v848_v29, %v844_v28 }
 0x57d   : > { %v878_v38 = vpop.permute.xlu1 %877 }
 0x57e   : > { %851 = vst.msk [vmem:[#allocation4] sm:$0xff] %vm290_vm1, %v850_v30 }
 0x585   : > { %v854_v31 = vld [vmem:[#allocation4] sm:$0xff] }
 0x586   : > { %v860_v33 = vmul.f32 %v858_v32, %v854_v31 }
 0x588   : > { %861 = vst.msk [vmem:[#allocation4] sm:$0xff] %vm556_vm5, %v860_v33 }
 0x58f   : > { %v864_v35 = vld [vmem:[#allocation4] sm:$0xff] }
 0x590   : > { %v870_v36 = vmul.f32 %v868_v34, %v864_v35 }
 0x592   : > { %871 = vst.msk [vmem:[#allocation4] sm:$0xff] %vm696_vm6, %v870_v36 }
 0x599   : > { %v874_v37 = vld [vmem:[#allocation4] sm:$0xff] }
 0x59a   : > { %v880_v39 = vmul.f32 %v878_v38, %v874_v37 }
 0x59c   : > { %881 = vst.msk [vmem:[#allocation4] sm:$0xff] %vm836_vm7, %v880_v39 }
 0x5a3   : > { %v882_v40 = vld [vmem:[#allocation4] sm:$0xff] }
 0x5a4   : > { %v883_v41 = vpack.c.bf16 %v882_v40, %v882_v40 }
 0x5a6   : > { %885 = vst.msk [vmem:[%s268_s5] sm:$0xf] %vm884_vm8, %v883_v41 }
 0x5a7 PF: > { %s13_s14 = sadd.s32 1, %s1179_s14   ;;  %s1368_s12 = smov %s1175_s13 }
 0x5a8   : > { %p10_p5 = scmp.ge.s32.totalorder %s13_s14, 4   ;;  %s1369_s13 = smov %s1371_s15 }
 0x5aa   :  { %12 = sbr.rel (!%p10_p5) target bundleno = 2 (0x2), region = 91 }

</bundles_post_ra>
